<compile_context>
chip_gen: v5e
topology: v5e:2x2
jax: 0.10.0
libtpu: 0.0.40
codegen_flags: <defaults>
</compile_context>

<pallas_src>
import functools

import jax
import jax.numpy as jnp
from jax import lax
from jax.experimental import pallas as pl
from jax.experimental.pallas import tpu as pltpu


def _round_up(x, m):
    return ((x + m - 1) // m) * m


def _qarepvgg_fused_kernel(xf_ref, w_ref, b_ref, o_ref, *,
                           row_offsets, tm, n_m, merge):
    """Fused reparameterized 3x3 conv + bias + ReLU over one spatial tile.

    xf_ref : (1, Lin_pad, Cin)                       flattened zero-padded activation
    w_ref  : (3, 3*Cin, Cout_p) if merge else (9, Cin, Cout_p)   folded weights
    b_ref  : (1, Cout_p)                             folded bias (f32)
    o_ref  : (1, TM, Cout_p)                         output rows [m*TM, (m+1)*TM)
    """
    if n_m == 1:
        base = 0                                     # fully static offsets
    else:
        base = pl.multiple_of(pl.program_id(1) * tm, 8)

    cout_p = o_ref.shape[-1]
    # Seed the accumulator with the bias: removes the zero-fill and the trailing add.
    acc = jnp.broadcast_to(b_ref[...], (tm, cout_p)).astype(jnp.float32)

    if merge:
        # One K = 3*Cin matmul per kernel row: the three kw windows are contiguous
        # rows of the flattened grid, concatenated along the channel (lane) axis.
        for kh, off in enumerate(row_offsets):
            xs = jnp.concatenate(
                [xf_ref[0, pl.ds(base + off + kw, tm), :] for kw in range(3)],
                axis=-1)                                            # (TM, 3*Cin)
            acc = acc + jnp.dot(xs, w_ref[kh],
                                preferred_element_type=jnp.float32)
    else:
        # Fallback for large Cin: 9 accumulating matmuls (K = Cin), one per tap.
        for t in range(9):
            off = row_offsets[t // 3] + (t % 3)
            xs = xf_ref[0, pl.ds(base + off, tm), :]                # (TM, Cin)
            acc = acc + jnp.dot(xs, w_ref[t],
                                preferred_element_type=jnp.float32)

    o_ref[0] = jnp.maximum(acc, 0.0).astype(o_ref.dtype)


def qarepvgg_forward(x, params, *, data_format="NCHW", tm_target=512,
                     compute_dtype=jnp.bfloat16, out_dtype=None,
                     merge_row_taps=None):
    """QARepVGG block forward.

    x: (N, Cin, H, W) if data_format=="NCHW", else (N, H, W, Cin).
    Assumes the module defaults: stride=1, dilation=1, groups=1, use_alpha=False,
    use_1x1_bias=True, use_post_bn=True, use_residual_connection=True (Cin==Cout).
    compute_dtype: MXU operand dtype (bf16 recommended; f32 for exact parity).
    """
    w3 = params["w3"]                 # (Cout, Cin, 3, 3)  PyTorch OIHW
    w1 = params["w1"]                 # (Cout, Cin, 1, 1)
    b1 = params["b1"]                 # (Cout,)
    eps = 1e-5
    alpha = 1.0                       # use_alpha=False

    if data_format == "NCHW":
        N, Cin, H, W = x.shape
        x_nhwc = jnp.transpose(x, (0, 2, 3, 1))
    elif data_format == "NHWC":
        N, H, W, Cin = x.shape
        x_nhwc = x
    else:
        raise ValueError(f"unsupported data_format {data_format!r}")

    Cout = w3.shape[0]
    assert Cin == Cout, "residual branch requires in_channels == out_channels"
    if out_dtype is None:
        out_dtype = x.dtype
    if merge_row_taps is None:
        merge_row_taps = (3 * Cin) <= 128        # small-K regime: merge same-row taps

    Wp = W + 2                        # padded width
    Lout = H * Wp                     # flattened output rows (cols W..W+1 discarded)

    # ---- fold 3x3-BN, 1x1+bias, identity, and post-BN into one weight + bias ----
    s3 = params["bn3_gamma"] / jnp.sqrt(params["bn3_var"] + eps)
    sh3 = params["bn3_beta"] - params["bn3_mean"] * s3
    ps = params["post_gamma"] / jnp.sqrt(params["post_var"] + eps)
    pb = params["post_beta"] - params["post_mean"] * ps

    w_taps = jnp.transpose(w3, (2, 3, 1, 0)) * (s3 * ps)[None, None, None, :]  # (3,3,Cin,Cout)
    center = w_taps[1, 1] + (alpha * jnp.transpose(w1[:, :, 0, 0], (1, 0))
                             + jnp.eye(Cin, Cout, dtype=jnp.float32)) * ps[None, :]
    w_taps = w_taps.at[1, 1].set(center)
    b_eq = ((sh3 + alpha * b1) * ps + pb).reshape(1, Cout)

    if merge_row_taps:
        w_eq = w_taps.reshape(3, 3 * Cin, Cout)   # K order = (kw, cin), matches concat
    else:
        w_eq = w_taps.reshape(9, Cin, Cout)

    # lane-dense output channels (unmasked stores / MXU N alignment)
    Cout_p = _round_up(Cout, 128)
    if Cout_p != Cout:
        w_eq = jnp.pad(w_eq, ((0, 0), (0, 0), (0, Cout_p - Cout)))
        b_eq = jnp.pad(b_eq, ((0, 0), (0, Cout_p - Cout)))

    # ---- activation prep: cast -> pad -> flatten padded grid ---------------------
    x_c = x_nhwc.astype(compute_dtype)                                 # cast before pad
    x_pad = jnp.pad(x_c, ((0, 0), (1, 1), (1, 1), (0, 0)))             # (N,H+2,Wp,Cin)
    xf = x_pad.reshape(N, (H + 2) * Wp, Cin)

    # spatial tiling of the flattened output rows
    tm = min(_round_up(tm_target, 8), _round_up(Lout, 8))
    n_m = (Lout + tm - 1) // tm
    Lout_pad = n_m * tm
    halo = 2 * Wp + 2                                                  # max tap offset
    Lin_pad = _round_up(Lout_pad + halo, 8)
    xf = jnp.pad(xf, ((0, 0), (0, Lin_pad - (H + 2) * Wp), (0, 0)))

    row_offsets = (0, Wp, 2 * Wp)

    w_c = w_eq.astype(compute_dtype)
    b_c = b_eq.astype(jnp.float32)
    taps, k_dim = w_c.shape[0], w_c.shape[1]

    kernel = functools.partial(_qarepvgg_fused_kernel, row_offsets=row_offsets,
                               tm=tm, n_m=n_m, merge=merge_row_taps)

    grid_spec = pltpu.PrefetchScalarGridSpec(
        num_scalar_prefetch=0,
        grid=(N, n_m),
        in_specs=[
            pl.BlockSpec((1, Lin_pad, Cin), lambda n, m: (n, 0, 0)),     # activation slab
            pl.BlockSpec((taps, k_dim, Cout_p), lambda n, m: (0, 0, 0)),  # folded weights
            pl.BlockSpec((1, Cout_p), lambda n, m: (0, 0)),               # folded bias
        ],
        out_specs=pl.BlockSpec((1, tm, Cout_p), lambda n, m: (n, m, 0)),
    )

    # Honest VMEM estimate: double-buffered operands + output tile, plus in-kernel
    # f32 accumulator / merged-LHS temporaries and headroom. Cap at 48 MiB so the
    # 64 MiB/TC on v7x is never fully requested (leave compiler scratch room).
    isz = jnp.dtype(compute_dtype).itemsize
    osz = jnp.dtype(out_dtype).itemsize
    scratch = tm * Cout_p * 4 + tm * k_dim * isz + (2 << 20)
    need = (2 * Lin_pad * Cin * isz
            + 2 * taps * k_dim * Cout_p * isz
            + 2 * Cout_p * 4
            + 2 * tm * Cout_p * osz
            + scratch)
    vmem_bytes = min(max(16 << 20, need), max(48 << 20, need))

    # Shard only the batch axis across TensorCores when N >= 2 so each core doesn't
    # re-DMA the full per-batch activation slab; only use the m axis when N == 1.
    dims = ("parallel", "arbitrary") if N > 1 else ("parallel", "parallel")

    out_flat = pl.pallas_call(
        kernel,
        out_shape=jax.ShapeDtypeStruct((N, Lout_pad, Cout_p), out_dtype),
        grid_spec=grid_spec,
        compiler_params=pltpu.CompilerParams(
            dimension_semantics=dims, vmem_limit_bytes=vmem_bytes),
    )(xf, w_c, b_c)

    # drop padded rows/channels and the 2 garbage columns per row
    out = out_flat[:, :Lout, :Cout].reshape(N, H, Wp, Cout)[:, :, :W, :]
    if data_format == "NCHW":
        out = jnp.transpose(out, (0, 3, 1, 2))
    return out


def _reference_forward(x_nchw, params):
    """Plain-JAX reference mirroring the PyTorch forward (eval-mode BN), f32."""
    eps = 1e-5
    dn = ("NCHW", "OIHW", "NCHW")
    c3 = lax.conv_general_dilated(x_nchw, params["w3"], (1, 1), ((1, 1), (1, 1)),
                                  dimension_numbers=dn,
                                  precision=lax.Precision.HIGHEST)
    s3 = (params["bn3_gamma"] / jnp.sqrt(params["bn3_var"] + eps)).reshape(1, -1, 1, 1)
    x3 = c3 * s3 + (params["bn3_beta"].reshape(1, -1, 1, 1)
                    - params["bn3_mean"].reshape(1, -1, 1, 1) * s3)
    c1 = lax.conv_general_dilated(x_nchw, params["w1"], (1, 1), ((0, 0), (0, 0)),
                                  dimension_numbers=dn,
                                  precision=lax.Precision.HIGHEST)
    x1 = c1 + params["b1"].reshape(1, -1, 1, 1)
    branches = x3 + x1 + x_nchw
    sp = (params["post_gamma"] / jnp.sqrt(params["post_var"] + eps)).reshape(1, -1, 1, 1)
    out = branches * sp + (params["post_beta"].reshape(1, -1, 1, 1)
                           - params["post_mean"].reshape(1, -1, 1, 1) * sp)
    return jnp.maximum(out, 0.0)


def _init_params(key, cin, cout):
    ks = jax.random.split(key, 10)
    return {
        "w3": 0.2 * jax.random.normal(ks[0], (cout, cin, 3, 3), jnp.float32),
        "w1": 0.2 * jax.random.normal(ks[1], (cout, cin, 1, 1), jnp.float32),
        "b1": 0.1 * jax.random.normal(ks[2], (cout,), jnp.float32),
        "bn3_gamma": 1.0 + 0.1 * jax.random.normal(ks[3], (cout,), jnp.float32),
        "bn3_beta": 0.1 * jax.random.normal(ks[4], (cout,), jnp.float32),
        "bn3_mean": 0.1 * jax.random.normal(ks[5], (cout,), jnp.float32),
        "bn3_var": 1.0 + jnp.abs(0.1 * jax.random.normal(ks[6], (cout,), jnp.float32)),
        "post_gamma": 1.0 + 0.1 * jax.random.normal(ks[7], (cout,), jnp.float32),
        "post_beta": 0.1 * jax.random.normal(ks[8], (cout,), jnp.float32),
        "post_mean": 0.1 * jax.random.normal(ks[9], (cout,), jnp.float32),
        "post_var": jnp.ones((cout,), jnp.float32),
    }


if __name__ == "__main__":
    key = jax.random.PRNGKey(0)
    k_x, k_p = jax.random.split(key)
    N, C, H, W = 2, 4, 16, 16             # in_channels == out_channels (residual branch)
    x = jax.random.normal(k_x, (N, C, H, W), jnp.float32)
    params = _init_params(k_p, C, C)

    ref = _reference_forward(x, params)

    # Default config: bf16 MXU operands, merged same-row taps, f32 output.
    out = jax.block_until_ready(qarepvgg_forward(x, params))
    assert out.shape == (N, C, H, W)
    assert jnp.allclose(out, ref, rtol=3e-2, atol=3e-2), "bf16 kernel mismatch vs reference"

    # Exact-parity config: f32 MXU operands (same merged-tap path).
    out_f32 = jax.block_until_ready(
        qarepvgg_forward(x, params, compute_dtype=jnp.float32))
    assert jnp.allclose(out_f32, ref, rtol=1e-2, atol=1e-2), "f32 kernel mismatch vs reference"

    # Unmerged 9-tap fallback path (used when Cin is large).
    out_unmerged = jax.block_until_ready(
        qarepvgg_forward(x, params, compute_dtype=jnp.float32, merge_row_taps=False))
    assert jnp.allclose(out_unmerged, ref, rtol=1e-2, atol=1e-2), "fallback path mismatch"

    print("KERNEL_OK")
</pallas_src>

<mosaic_0001>
module attributes {stable_mosaic.version = 11 : i64} {
  func.func @_qarepvgg_fused_kernel(%arg0: i32, %arg1: i32, %arg2: memref<1x328x4xbf16, #tpu.memory_space<vmem>>, %arg3: memref<3x12x128xbf16, #tpu.memory_space<vmem>>, %arg4: memref<1x128xf32, #tpu.memory_space<vmem>>, %arg5: memref<1x288x128xf32, #tpu.memory_space<vmem>>) attributes {dimension_semantics = [#tpu.dimension_semantics<parallel>, #tpu.dimension_semantics<arbitrary>], iteration_bounds = array<i64: 2, 1>, scalar_prefetch = 0 : i64, scratch_operands = 0 : i64, tpu.core_type = #tpu.core_type<tc>, window_params = [{transform_indices = @transform_0, window_bounds = array<i64: 1, 328, 4>}, {pipeline_mode = #tpu.pipeline_mode<synchronous>, transform_indices = @transform_1, window_bounds = array<i64: 3, 12, 128>}, {pipeline_mode = #tpu.pipeline_mode<synchronous>, transform_indices = @transform_2, window_bounds = array<i64: 1, 128>}, {transform_indices = @transform_3, window_bounds = array<i64: 1, 288, 128>}]} {
    %c0 = arith.constant 0 : index
    %c0_0 = arith.constant 0 : index
    %0 = vector.load %arg4[%c0, %c0_0] : memref<1x128xf32, #tpu.memory_space<vmem>>, vector<1x128xf32>
    %1 = vector.shape_cast %0 : vector<1x128xf32> to vector<1x128xf32>
    %2 = vector.broadcast %1 : vector<1x128xf32> to vector<288x128xf32>
    %c0_1 = arith.constant 0 : index
    %c0_2 = arith.constant 0 : index
    %c0_3 = arith.constant 0 : index
    %3 = vector.load %arg2[%c0_1, %c0_2, %c0_3] : memref<1x328x4xbf16, #tpu.memory_space<vmem>>, vector<1x288x4xbf16>
    %4 = vector.shape_cast %3 : vector<1x288x4xbf16> to vector<288x4xbf16>
    %c0_4 = arith.constant 0 : index
    %c1 = arith.constant 1 : index
    %c0_5 = arith.constant 0 : index
    %5 = vector.load %arg2[%c0_4, %c1, %c0_5] : memref<1x328x4xbf16, #tpu.memory_space<vmem>>, vector<1x288x4xbf16>
    %6 = vector.shape_cast %5 : vector<1x288x4xbf16> to vector<288x4xbf16>
    %c0_6 = arith.constant 0 : index
    %c2 = arith.constant 2 : index
    %c0_7 = arith.constant 0 : index
    %7 = vector.load %arg2[%c0_6, %c2, %c0_7] : memref<1x328x4xbf16, #tpu.memory_space<vmem>>, vector<1x288x4xbf16>
    %8 = vector.shape_cast %7 : vector<1x288x4xbf16> to vector<288x4xbf16>
    %9 = tpu.concatenate %4, %6, %8 in 1 : vector<288x4xbf16>, vector<288x4xbf16>, vector<288x4xbf16> -> vector<288x12xbf16>
    %c0_8 = arith.constant 0 : index
    %c0_9 = arith.constant 0 : index
    %c0_10 = arith.constant 0 : index
    %10 = vector.load %arg3[%c0_8, %c0_9, %c0_10] : memref<3x12x128xbf16, #tpu.memory_space<vmem>>, vector<1x12x128xbf16>
    %11 = vector.shape_cast %10 : vector<1x12x128xbf16> to vector<12x128xbf16>
    %cst = arith.constant dense<0.000000e+00> : vector<288x128xf32>
    %12 = tpu.matmul %9, %11, %cst {dimension_numbers = #tpu.dot_dimension_numbers<[1], [0], [0], [1], [0, 0, 1, 1], [], []>} : vector<288x12xbf16>, vector<12x128xbf16>, vector<288x128xf32> -> vector<288x128xf32>
    %13 = arith.addf %2, %12 : vector<288x128xf32>
    %c0_11 = arith.constant 0 : index
    %c18 = arith.constant 18 : index
    %c0_12 = arith.constant 0 : index
    %14 = vector.load %arg2[%c0_11, %c18, %c0_12] : memref<1x328x4xbf16, #tpu.memory_space<vmem>>, vector<1x288x4xbf16>
    %15 = vector.shape_cast %14 : vector<1x288x4xbf16> to vector<288x4xbf16>
    %c0_13 = arith.constant 0 : index
    %c19 = arith.constant 19 : index
    %c0_14 = arith.constant 0 : index
    %16 = vector.load %arg2[%c0_13, %c19, %c0_14] : memref<1x328x4xbf16, #tpu.memory_space<vmem>>, vector<1x288x4xbf16>
    %17 = vector.shape_cast %16 : vector<1x288x4xbf16> to vector<288x4xbf16>
    %c0_15 = arith.constant 0 : index
    %c20 = arith.constant 20 : index
    %c0_16 = arith.constant 0 : index
    %18 = vector.load %arg2[%c0_15, %c20, %c0_16] : memref<1x328x4xbf16, #tpu.memory_space<vmem>>, vector<1x288x4xbf16>
    %19 = vector.shape_cast %18 : vector<1x288x4xbf16> to vector<288x4xbf16>
    %20 = tpu.concatenate %15, %17, %19 in 1 : vector<288x4xbf16>, vector<288x4xbf16>, vector<288x4xbf16> -> vector<288x12xbf16>
    %c1_17 = arith.constant 1 : index
    %c0_18 = arith.constant 0 : index
    %c0_19 = arith.constant 0 : index
    %21 = vector.load %arg3[%c1_17, %c0_18, %c0_19] : memref<3x12x128xbf16, #tpu.memory_space<vmem>>, vector<1x12x128xbf16>
    %22 = vector.shape_cast %21 : vector<1x12x128xbf16> to vector<12x128xbf16>
    %cst_20 = arith.constant dense<0.000000e+00> : vector<288x128xf32>
    %23 = tpu.matmul %20, %22, %cst_20 {dimension_numbers = #tpu.dot_dimension_numbers<[1], [0], [0], [1], [0, 0, 1, 1], [], []>} : vector<288x12xbf16>, vector<12x128xbf16>, vector<288x128xf32> -> vector<288x128xf32>
    %24 = arith.addf %13, %23 : vector<288x128xf32>
    %c0_21 = arith.constant 0 : index
    %c36 = arith.constant 36 : index
    %c0_22 = arith.constant 0 : index
    %25 = vector.load %arg2[%c0_21, %c36, %c0_22] : memref<1x328x4xbf16, #tpu.memory_space<vmem>>, vector<1x288x4xbf16>
    %26 = vector.shape_cast %25 : vector<1x288x4xbf16> to vector<288x4xbf16>
    %c0_23 = arith.constant 0 : index
    %c37 = arith.constant 37 : index
    %c0_24 = arith.constant 0 : index
    %27 = vector.load %arg2[%c0_23, %c37, %c0_24] : memref<1x328x4xbf16, #tpu.memory_space<vmem>>, vector<1x288x4xbf16>
    %28 = vector.shape_cast %27 : vector<1x288x4xbf16> to vector<288x4xbf16>
    %c0_25 = arith.constant 0 : index
    %c38 = arith.constant 38 : index
    %c0_26 = arith.constant 0 : index
    %29 = vector.load %arg2[%c0_25, %c38, %c0_26] : memref<1x328x4xbf16, #tpu.memory_space<vmem>>, vector<1x288x4xbf16>
    %30 = vector.shape_cast %29 : vector<1x288x4xbf16> to vector<288x4xbf16>
    %31 = tpu.concatenate %26, %28, %30 in 1 : vector<288x4xbf16>, vector<288x4xbf16>, vector<288x4xbf16> -> vector<288x12xbf16>
    %c2_27 = arith.constant 2 : index
    %c0_28 = arith.constant 0 : index
    %c0_29 = arith.constant 0 : index
    %32 = vector.load %arg3[%c2_27, %c0_28, %c0_29] : memref<3x12x128xbf16, #tpu.memory_space<vmem>>, vector<1x12x128xbf16>
    %33 = vector.shape_cast %32 : vector<1x12x128xbf16> to vector<12x128xbf16>
    %cst_30 = arith.constant dense<0.000000e+00> : vector<288x128xf32>
    %34 = tpu.matmul %31, %33, %cst_30 {dimension_numbers = #tpu.dot_dimension_numbers<[1], [0], [0], [1], [0, 0, 1, 1], [], []>} : vector<288x12xbf16>, vector<12x128xbf16>, vector<288x128xf32> -> vector<288x128xf32>
    %35 = arith.addf %24, %34 : vector<288x128xf32>
    %cst_31 = arith.constant 0.000000e+00 : f32
    %36 = vector.broadcast %cst_31 : f32 to vector<288x128xf32>
    %37 = arith.maximumf %35, %36 : vector<288x128xf32>
    %c0_32 = arith.constant 0 : index
    %c0_33 = arith.constant 0 : index
    %c0_34 = arith.constant 0 : index
    %38 = vector.load %arg5[%c0_32, %c0_33, %c0_34] : memref<1x288x128xf32, #tpu.memory_space<vmem>>, vector<1x288x128xf32>
    %39 = vector.shape_cast %38 : vector<1x288x128xf32> to vector<288x128xf32>
    %40 = vector.shape_cast %37 : vector<288x128xf32> to vector<1x288x128xf32>
    tpu.vector_store %arg5[%c0_32, %c0_33, %c0_34], %40 {strides = array<i32>} : memref<1x288x128xf32, #tpu.memory_space<vmem>>, vector<1x288x128xf32>,
    return
  }
  func.func @transform_0(%arg0: i32, %arg1: i32) -> (i32, i32, i32) {
    %c0_i32 = arith.constant 0 : i32
    %c0_i32_0 = arith.constant 0 : i32
    %c0_i32_1 = arith.constant 0 : i32
    return %arg0, %c0_i32, %c0_i32_0 : i32, i32, i32
  }
  func.func @transform_1(%arg0: i32, %arg1: i32) -> (i32, i32, i32) {
    %c0_i32 = arith.constant 0 : i32
    %c0_i32_0 = arith.constant 0 : i32
    %c0_i32_1 = arith.constant 0 : i32
    %c0_i32_2 = arith.constant 0 : i32
    return %c0_i32, %c0_i32_0, %c0_i32_1 : i32, i32, i32
  }
  func.func @transform_2(%arg0: i32, %arg1: i32) -> (i32, i32) {
    %c0_i32 = arith.constant 0 : i32
    %c0_i32_0 = arith.constant 0 : i32
    %c0_i32_1 = arith.constant 0 : i32
    return %c0_i32, %c0_i32_0 : i32, i32
  }
  func.func @transform_3(%arg0: i32, %arg1: i32) -> (i32, i32, i32) {
    %c0_i32 = arith.constant 0 : i32
    %c0_i32_0 = arith.constant 0 : i32
    return %arg0, %arg1, %c0_i32 : i32, i32, i32
  }
}

</mosaic_0001>

<bundles_post_ra>
// kernel: tpu_custom_call.1
= control target key start
LH: loop header
LB: loop body
LE: loop exit
PB: predicated region body
PF: predicated region fallthrough
CT: control target
= control target key end

     0   :  { %8 = vsyncpa [#allocation3], 0  ;;  %s4473_s0 = inlined_call_operand.vmem [shape: bf16[2,328,4], index: 0, kind: input, shape index: {}]   ;;  %s4474_s1 = inlined_call_operand.vmem [shape: bf16[3,12,128], index: 1, kind: input, shape index: {}]   ;;  %s4475_s2 = inlined_call_operand.vmem [shape: f32[1,128], index: 2, kind: input, shape index: {}]   ;;  %s4476_s3 = inlined_call_operand.hbm [shape: f32[2,288,128], index: 3, kind: output, shape index: {}]  }
   0x1   :  { %10 = vsyncpa [#allocation3 + $0x1], 0  ;;  %s2985_s12 = smov 0   ;;  %s2987_s13 = smov 0  }
   0x2   :  { %s2989_s14 = smov 0   ;;  %s2991_s15 = smov 0  }
   0x3   :  { %s2993_s16 = smov 0   ;;  %s2995_s17 = smov 0  }
   0x4 LB: > { %s2473_s18 = sadd.s32 4294967295, %s2960_s17   ;;  %s2474_s19 = sadd.s32 4294967294, %s2960_s17   ;;  %s2960_s17 = sphi %s2995_s17, %s16_s17   ;;  %s2956_s16 = sphi %s2993_s16, %s4501_s16   ;;  %s2952_s15 = sphi %s2991_s15, %s4500_s15   ;;  %s2948_s14 = sphi %s2989_s14, %s4499_s14   ;;  %s2944_s13 = sphi %s2987_s13, %s4498_s13   ;;  %s2940_s12 = sphi %s2985_s12, %s4497_s12  }
   0x5   : > { %s28_s20 = sadd.s32 1, %s2956_s16  ;;  %s105_s21 = sadd.s32 1, %s2948_s14 }
   0x6   : > { %p30_p0 = scmp.ge.s32.totalorder %s28_s20, 2  ;;  %p115_p1 = scmp.ne.s32.totalorder %s2948_s14, %s2944_s13 }
   0x7   : > { %p116_p2 = scmp.eq.s32.totalorder %s2473_s18, 1  ;;  %p121_p3 = scmp.ne.s32.totalorder %s2944_s13, %s2940_s12 }
   0x8   : > { %s4503_s20 = smov (%p30_p0, %s28_s20), 0  ;;  %p122_p5 = scmp.eq.s32.totalorder %s2474_s19, 1 }
   0x9   : > { %p3025_p4 = por %p116_p2, %p115_p1  ;;  %s100_s23 = ssub.s32 %s2956_s16, %s4503_s20 }
   0xa   : > { %p2477_p6 = scmp.ge.s32.totalorder %s2960_s17, 1  ;;  %p103_p7 = scmp.eq.s32.totalorder %s100_s23, 0 }
   0xb   : > { %p3032_p8 = por %p122_p5, %p121_p3  ;;  %p154_p9 = scmp.lt.s32.totalorder %s2960_s17, 3 }
   0xc   : > { %s3038_s25 = scalar_select %p103_p7, %s2948_s14, %s105_s21  }
   0xd   : > { %p155_p10 = pnand %p2477_p6, %p154_p9 }
   0xe   : > { %p178_p11 = scmp.lt.s32.totalorder (!%p155_p10), %s2952_s15, 1  ;;  %s2962_s4 = smov (!%p155_p10), 8  }
   0xf   : > { %158 = sbr.rel (%p155_p10) target bundleno = 593 (0x251), region = 32  ;;  %s2963_s5 = smov (!%p155_p10), 4  }
  0x10   : > { %s175_s6 = sand.u32 (!%p155_p10), 1, %s2944_s13  }
  0x11   : > { %s2820_s7 = smul.u32 (!%p155_p10), 288, %s175_s6  ;;  %s2383_s18 = scalar_lea.sflag (!%p155_p10), [#allocation3], %s175_s6 }
  0x13   : > { %s4129_s8 = scalar_lea.vmem (!%p155_p10), [#allocation2], %s2820_s7 }
  0x14   : > { %s179_s26 = scalar_select %p178_p11, %s2952_s15, 1  ;;  %vm508_vm0 = vcmask 1046528   ;;  %vm320_vm1 = vsmask.f32 7424  ;;  %vm700_vm2 = vcmask 1045504   ;;  %vm582_vm3 = vcmask 31744  }
  0x15   : > { %vm619_vm4 = vcmask 64512   ;;  %vm663_vm5 = vcmask 97280  }
  0x16   : > { %s2821_s27 = smul.u32 164, %s179_s26 }
  0x18   : > { %s3045_s30 = scalar_lea.vmem %s4473_s0, %s2821_s27  ;;  %s2902_s27 = scalar_lea.hbm %s4476_s3, 576 }
  0x19   : > { %v3048_v0 = vld [vmem:[%s3045_s30 + $0x18] sm:$0xff]  ;;  %v3051_v1 = vld [vmem:[%s3045_s30 + $0x20] sm:$0xff]  ;;  %v3054_v2 = vld [vmem:[%s3045_s30 + $0x10] sm:$0xff] }
  0x1a   : > { %v3057_v3 = vld [vmem:[%s3045_s30 + $0x18] sm:$0xff]  ;;  %v3060_v4 = vld [vmem:[%s3045_s30] sm:$0xff]   ;;  %v3063_v5 = vld [vmem:[%s3045_s30 + $0x8] sm:$0xff]  ;;  %v1902_v6 = vrot.slane %v3048_v0, 1  ;;  %v1904_v7 = vrot.slane %v3051_v1, 1  ;;  %v1167_v8 = vrot.slane %v3054_v2, 1 }
  0x1b   : > { %v322_v9 = vshrl.u32 %v3060_v4, 16  ;;  %v1575_v10 = vld [vmem:[%s3045_s30 + $0x14] sm:$0xf]  ;;  %v1169_v11 = vrot.slane %v3057_v3, 1  ;;  %v324_v12 = vshll.u32 %v3060_v4, 16  ;;  %v329_v13 = vshll.u32 %v3063_v5, 16 }
  0x1c   : > { %v1612_v14 = vld [vmem:[%s3045_s30 + $0x10] sm:$0x8]  ;;  %v1651_v15 = vunpack.c.l.b16 %v1575_v10  ;;  %v1905_v16 = vsel %vm508_vm0, %v1902_v6, %v1904_v7  ;;  %v982_v19 = vshll.u32 %v3054_v2, 16  ;;  %v986_v20 = vshrl.u32 %v3054_v2, 16  ;;  %v840_v25 = vld [vmem:[%s3045_s30 + $0xc] sm:$0xf] }
  0x1d   : > { %v1899_v17 = vunpack.c.l.b16 %v1612_v14  ;;  %v1574_v18 = vld [vmem:[%s3045_s30 + $0x10] sm:$0xc]  ;;  %1940 = vrot.lane.b32.xlu1 %v1905_v16, %s2962_s4  ;;  %v1170_v21 = vsel %vm508_vm0, %v1167_v8, %v1169_v11  ;;  %v326_v22 = vrot.slane %v324_v12, 1  ;;  %v3084_v23 = vrot.slane %v329_v13, 1  ;;  %v877_v30 = vld [vmem:[%s3045_s30 + $0x8] sm:$0xc] }
  0x1e   : > { %v1650_v24 = vunpack.c.l.b16 %v1574_v18  ;;  %1205 = vrot.lane.b32.xlu2 %v1170_v21, %s2962_s4  ;;  %v984_v27 = vrot.slane %v982_v19, 1  ;;  %v990_v28 = vshll.u32 %v3057_v3, 16  ;;  %v1717_v29 = vshll.u32 %v3048_v0, 16  ;;  %v839_v35 = vld [vmem:[%s3045_s30 + $0x8] sm:$0xe]  ;;  %v3126_v14 = vld [vmem:[%s3045_s30 + $0x10] sm:$0xff] }
  0x1f   : > { %v1900_v26 = vpack.c.b16 %v1651_v15, %v1899_v17  ;;  %v327_v31 = vor.u32 %v326_v22, %v322_v9  ;;  %v1721_v33 = vshrl.u32 %v3048_v0, 16  ;;  %v1725_v34 = vshll.u32 %v3051_v1, 16  ;;  %v3112_v54 = vld [vmem:[%s3045_s30 + $0x28] sm:$0xff]  ;;  %v2814_v9 = vld [vmem:[%s3045_s30] sm:$0xf0] }
  0x20   : > { %v3091_v32 = vpack.c.b16 %v1651_v15, %v1650_v24  ;;  %v988_v37 = vor.u32 %v986_v20, %v984_v27  ;;  %v3096_v38 = vrot.slane %v990_v28, 1  ;;  %v1719_v39 = vrot.slane %v1717_v29, 1  ;;  %v2815_v10 = vld [vmem:[%s3045_s30] sm:$0xe] }
  0x21   : > { %v1901_v36 = vrot.slane %v1900_v26, 1  ;;  %v332_v40 = vsel %vm320_vm1, %v327_v31, %v3084_v23  ;;  %v916_v41 = vunpack.c.l.b16 %v840_v25  ;;  %v1164_v42 = vunpack.c.l.b16 %v877_v30  ;;  %v3139_v24 = vld [vmem:[%s3045_s30 + $0x20] sm:$0xff] }
  0x22   : > { %469 = vrot.lane.b32.xlu0 %v332_v40, %s2963_s5  ;;  %v1727_v44 = vrot.slane %v1725_v34, 1  ;;  %v915_v45 = vunpack.c.l.b16 %v839_v35  ;;  %v993_v46 = vsel %vm320_vm1, %v988_v37, %v3096_v38  ;;  %v1723_v47 = vor.u32 %v1721_v33, %v1719_v39 }
  0x23   : > { %v1903_v43 = vsel %vm508_vm0, %v1901_v36, %v1902_v6  ;;  %v1165_v48 = vpack.c.b16 %v916_v41, %v1164_v42  ;;  %v1712_v49 = vshll.u32 %v3091_v32, 16  ;;  %v1710_v56 = vshrl.u32 %v3091_v32, 16  ;;  %v3164_v42 = vld [vmem:[%s3045_s30 + $0x28] sm:$0xff] }
  0x24   : > { %v3105_v50 = vpack.c.b16 %v916_v41, %v915_v45  ;;  %v1728_v55 = vsel %vm320_vm1, %v1723_v47, %v1727_v44  ;;  %v1729_v61 = vshrl.u32 %v3051_v1, 16  ;;  %v1733_v62 = vshll.u32 %v3112_v54, 16  ;;  %v3174_v45 = vld [vmem:[%s3045_s30 + $0x78] sm:$0xff] }
  0x25   : > { %1938 = vrot.lane.b32.xlu1 %v1903_v43, %s2962_s4  ;;  %v1166_v51 = vrot.slane %v1165_v48, 1  ;;  %v1714_v57 = vrot.slane %v1712_v49, 1  ;;  %v1906_v15 = vrot.slane %v3112_v54, 1  ;;  %v2816_v16 = vor.u32 %v2815_v10, %v2814_v9  ;;  %v3167_v43 = vld [vmem:[%s3045_s30 + $0x70] sm:$0xff]  ;;  %v3203_v9 = vld [vmem:[%s3045_s30 + $0x80] sm:$0xff] }
  0x26   : > { %1127 = vrot.lane.b32.xlu2 %v993_v46, %s2963_s5  ;;  %v975_v52 = vshrl.u32 %v3105_v50, 16  ;;  %v977_v53 = vshll.u32 %v3105_v50, 16  ;;  %v1731_v12 = vor.u32 %v1729_v61, %v1727_v44  ;;  %v1735_v13 = vrot.slane %v1733_v62, 1 }
  0x27   : > { %v1168_v59 = vsel %vm508_vm0, %v1166_v51, %v1167_v8  ;;  %v1715_v63 = vor.u32 %v1714_v57, %v1710_v56  ;;  %v333_v18 = vshrl.u32 %v3063_v5, 16  ;;  %v337_v19 = vshll.u32 %v3126_v14, 16 }
  0x28   : > { %v979_v58 = vrot.slane %v977_v53, 1  ;;  %v1736_v17 = vsel %vm320_vm1, %v1731_v12, %v1735_v13  ;;  %v1907_v20 = vsel %vm508_vm0, %v1904_v7, %v1906_v15  ;;  %v509_v21 = vrot.slane %v2816_v16, 1 }
  0x29   : > { %v1720_v8 = vsel %vm320_vm1, %v1715_v63, %v1719_v39  ;;  %v510_v22 = vrot.slane %v3063_v5, 1  ;;  %v335_v25 = vor.u32 %v333_v18, %v3084_v23  ;;  %v339_v26 = vrot.slane %v337_v19, 1  ;;  %v3197_v63 = vld [vmem:[%s3045_s30 + $0x18] sm:$0xff] }
  0x2a   : > { %1862 = vrot.lane.b32.xlu0 %v1728_v55, %s2963_s5  ;;  %v980_v60 = vor.u32 %v979_v58, %v975_v52  ;;  %v1171_v29 = vrot.slane %v3139_v24, 1  ;;  %v994_v7 = vshrl.u32 %v3057_v3, 16  ;;  %v998_v30 = vshll.u32 %v3139_v24, 16  ;;  %v3216_v18 = vld [vmem:[%s3045_s30 + $0x38] sm:$0xff] }
  0x2b   : > { %v511_v28 = vsel %vm508_vm0, %v509_v21, %v510_v22  ;;  %v340_v31 = vsel %vm320_vm1, %v335_v25, %v339_v26  ;;  %v1737_v33 = vshrl.u32 %v3112_v54, 16  ;;  %v1002_v44 = vshrl.u32 %v3139_v24, 16 }
  0x2c   : > { %v985_v6 = vsel %vm320_vm1, %v980_v60, %v984_v27  ;;  %v3145_v27 = vld [vmem:[%s3045_s30 + $0x30] sm:$0xff]  ;;  %v1172_v34 = vsel %vm508_vm0, %v1169_v11, %v1171_v29  ;;  %v996_v35 = vor.u32 %v994_v7, %v3096_v38  ;;  %v1000_v36 = vrot.slane %v998_v30, 1 }
  0x2d   : > { %1203 = vrot.lane.b32.xlu1 %v1168_v59, %s2962_s4  ;;  %v1741_v23 = vshll.u32 %v3145_v27, 16  ;;  %v1739_v37 = vor.u32 %v1737_v33, %v1735_v13  ;;  %v1908_v41 = vrot.slane %v3145_v27, 1  ;;  %v512_v38 = vrot.slane %v3126_v14, 1  ;;  %v3229_v33 = vld [vmem:[%s3045_s30 + $0x20] sm:$0xff] }
  0x2e   : > { %1125 = vrot.lane.b32.xlu2 %v985_v6, %s2963_s5  ;;  %v1001_v40 = vsel %vm320_vm1, %v996_v35, %v1000_v36  ;;  %v1006_v47 = vshll.u32 %v3164_v42, 16  ;;  %v433_v48 = vshll.u32 %v3167_v43, 16  ;;  %v1004_v51 = vor.u32 %v1002_v44, %v1000_v36 }
  0x2f   : > { %v1743_v39 = vrot.slane %v1741_v23, 1  ;;  %v1909_v46 = vsel %vm508_vm0, %v1906_v15, %v1908_v41  ;;  %v513_v49 = vsel %vm508_vm0, %v510_v22, %v512_v38  ;;  %v4477_v52 = vrot.slane %v3167_v43, 1 }
  0x30   : > { %v538_v53 = vrot.slane %v3174_v45, 1  ;;  %v1008_v55 = vrot.slane %v1006_v47, 1  ;;  %v3184_v56 = vrot.slane %v433_v48, 1  ;;  %v437_v57 = vshrl.u32 %v3167_v43, 16  ;;  %v3242_v48 = vld [vmem:[%s3045_s30 + $0x40] sm:$0xff] }
  0x31   : > { %v1744_v11 = vsel %vm320_vm1, %v1739_v37, %v1743_v39  ;;  %v441_v58 = vshll.u32 %v3174_v45, 16  ;;  %v1173_v6 = vrot.slane %v3164_v42, 1  ;;  %v514_v12 = vrot.slane %v3197_v63, 1 }
  0x32   : > { %1860 = vrot.lane.b32.xlu0 %v1720_v8, %s2963_s5  ;;  %v539_v59 = vsel %vm508_vm0, %v4477_v52, %v538_v53  ;;  %v1009_v60 = vsel %vm320_vm1, %v1004_v51, %v1008_v55  ;;  %v439_v61 = vor.u32 %v437_v57, %v3184_v56  ;;  %v341_v13 = vshrl.u32 %v3126_v14, 16 }
  0x33   : > { %v443_v62 = vrot.slane %v441_v58, 1  ;;  %v345_v8 = vshll.u32 %v3197_v63, 16  ;;  %v1174_v15 = vsel %vm508_vm0, %v1171_v29, %v1173_v6  ;;  %v445_v16 = vshrl.u32 %v3174_v45, 16  ;;  %v3223_v29 = vld [vmem:[%s3045_s30 + $0x30] sm:$0xff] }
  0x34   : > { %v515_v19 = vsel %vm508_vm0, %v512_v38, %v514_v12  ;;  %v1745_v30 = vshrl.u32 %v3145_v27, 16  ;;  %v1014_v35 = vshll.u32 %v3223_v29, 16  ;;  %v540_v51 = vrot.slane %v3203_v9, 1 }
  0x35   : > { %1864 = vrot.lane.b32.xlu1 %v1736_v17, %s2963_s5  ;;  %v444_v10 = vsel %vm320_vm1, %v439_v61, %v443_v62  ;;  %v449_v17 = vshll.u32 %v3203_v9, 16  ;;  %v347_v21 = vrot.slane %v345_v8, 1  ;;  %v447_v22 = vor.u32 %v445_v16, %v443_v62 }
  0x36   : > { %1942 = vrot.lane.b32.xlu2 %v1907_v20, %s2962_s4  ;;  %v343_v20 = vor.u32 %v341_v13, %v339_v26  ;;  %v1747_v36 = vor.u32 %v1745_v30, %v1743_v39  ;;  %v1016_v44 = vrot.slane %v1014_v35, 1  ;;  %v1753_v57 = vshrl.u32 %v3216_v18, 16 }
  0x37   : > { %v451_v25 = vrot.slane %v449_v17, 1  ;;  %v1757_v58 = vshll.u32 %v3242_v48, 16  ;;  %v453_v13 = vshrl.u32 %v3203_v9, 16  ;;  %v1175_v16 = vrot.slane %v3223_v29, 1 }
  0x38   : > { %v348_v7 = vsel %vm320_vm1, %v343_v20, %v347_v21  ;;  %v1912_v30 = vrot.slane %v3242_v48, 1 }
  0x39   : > { %v452_v26 = vsel %vm320_vm1, %v447_v22, %v451_v25  ;;  %v1759_v62 = vrot.slane %v1757_v58, 1  ;;  %v357_v22 = vshrl.u32 %v3229_v33, 16 }
  0x3a   : > { %546 = vrot.lane.b32.xlu0 %v511_v28, %s2962_s4  ;;  %v1910_v28 = vrot.slane %v3216_v18, 1 }
  0x3c   : > { %v1911_v23 = vsel %vm508_vm0, %v1908_v41, %v1910_v28 }
  0x3d   : > { %471 = vrot.lane.b32.xlu1 %v340_v31, %s2963_s5  ;;  %v1749_v31 = vshll.u32 %v3216_v18, 16 }
  0x3e   : > { %1207 = vrot.lane.b32.xlu2 %v1172_v34, %s2962_s4  ;;  %v1010_v34 = vshrl.u32 %v3164_v42, 16 }
  0x3f   : > { %v1751_v37 = vrot.slane %v1749_v31, 1  ;;  %v3288_v31 = vld [vmem:[%s3045_s30 + $0x38] sm:$0xff] }
  0x40   : > { %v1012_v38 = vor.u32 %v1010_v34, %v1008_v55  ;;  %v516_v55 = vrot.slane %v3229_v33, 1  ;;  %v1913_v34 = vsel %vm508_vm0, %v1910_v28, %v1912_v30  ;;  %v1177_v35 = vrot.slane %v3288_v31, 1 }
  0x41   : > { %v1755_v61 = vor.u32 %v1753_v57, %v1751_v37  ;;  %v3317_v57 = vld [vmem:[%s3045_s30 + $0x40] sm:$0xff] }
  0x42   : > { %1129 = vrot.lane.b32.xlu0 %v1001_v40, %s2963_s5  ;;  %v349_v40 = vshrl.u32 %v3197_v63, 16  ;;  %v1017_v39 = vsel %vm320_vm1, %v1012_v38, %v1016_v44  ;;  %v1761_v38 = vshrl.u32 %v3242_v48, 16  ;;  %v1178_v28 = vsel %vm508_vm0, %v1175_v16, %v1177_v35 }
  0x44   : > { %v351_v41 = vor.u32 %v349_v40, %v347_v21 }
  0x45   : > { %1866 = vrot.lane.b32.xlu1 %v1744_v11, %s2963_s5  ;;  %v353_v11 = vshll.u32 %v3229_v33, 16 }
  0x46   : > { %1944 = vrot.lane.b32.xlu2 %v1909_v46, %s2962_s4  ;;  %v1752_v46 = vsel %vm320_vm1, %v1747_v36, %v1751_v37  ;;  %v1018_v36 = vshrl.u32 %v3223_v29, 16  ;;  %v1022_v37 = vshll.u32 %v3288_v31, 16 }
  0x47   : > { %v355_v47 = vrot.slane %v353_v11, 1 }
  0x4a   : > { %548 = vrot.lane.b32.xlu0 %v513_v49, %s2962_s4  ;;  %v356_v49 = vsel %vm320_vm1, %v351_v41, %v355_v47  ;;  %v1020_v41 = vor.u32 %v1018_v36, %v1016_v44  ;;  %v2641_v44 = vld [vmem:[%s4474_s1 + $0x8] sm:$0xf] }
  0x4d   : > { %574 = vrot.lane.b32.xlu1 %v539_v59, %s2962_s4  ;;  %v3254_v59 = vld [vmem:[%s3045_s30 + $0x88] sm:$0xff] }
  0x4e   : > { %1131 = vrot.lane.b32.xlu2 %v1009_v60, %s2963_s5  ;;  %v541_v60 = vsel %vm508_vm0, %v538_v53, %v540_v51  ;;  %v457_v8 = vshll.u32 %v3254_v59, 16  ;;  %v455_v53 = vor.u32 %v453_v13, %v451_v25  ;;  %v542_v20 = vrot.slane %v3254_v59, 1 }
  0x50   : > { %v3269_v17 = vrot.slane %v457_v8, 1 }
  0x52   : > { %497 = vrot.lane.b32.xlu0 %v444_v10, %s2963_s5  ;;  %v517_v10 = vsel %vm508_vm0, %v514_v12, %v516_v55  ;;  %v1176_v12 = vsel %vm508_vm0, %v1173_v6, %v1175_v16  ;;  %v460_v21 = vsel %vm320_vm1, %v455_v53, %v3269_v17  ;;  %v359_v6 = vor.u32 %v357_v22, %v355_v47 }
  0x53   : > { %v1024_v47 = vrot.slane %v1022_v37, 1  ;;  %v1026_v22 = vshrl.u32 %v3288_v31, 16 }
  0x55   : > { %1209 = vrot.lane.b32.xlu1 %v1174_v15, %s2962_s4  ;;  %v1760_v15 = vsel %vm320_vm1, %v1755_v61, %v1759_v62 }
  0x56   : > { %550 = vrot.lane.b32.xlu2 %v515_v19, %s2962_s4  ;;  %v3272_v19 = vld [vmem:[%s3045_s30 + $0x28] sm:$0xff] }
  0x57   : > { %v361_v25 = vshll.u32 %v3272_v19, 16 }
  0x5a   : > { %473 = vrot.lane.b32.xlu0 %v348_v7, %s2963_s5  ;;  %v543_v7 = vsel %vm508_vm0, %v540_v51, %v542_v20 }
  0x5d   : > { %1946 = vrot.lane.b32.xlu1 %v1911_v23, %s2962_s4  ;;  %v3295_v23 = vld [vmem:[%s3045_s30 + $0x48] sm:$0xff] }
  0x5e   : > { %499 = vrot.lane.b32.xlu2 %v452_v26, %s2963_s5  ;;  %v3292_v26 = vrot.slane %v361_v25, 1  ;;  %v1914_v61 = vrot.slane %v3295_v23, 1  ;;  %v2733_v25 = vld [vmem:[%s4474_s1 + $0x10] sm:$0xf] }
  0x60   : > { %v364_v11 = vsel %vm320_vm1, %v359_v6, %v3292_v26 }
  0x62   : > { %1868 = vrot.lane.b32.xlu0 %v1752_v46, %s2963_s5  ;;  %v1765_v46 = vshll.u32 %v3295_v23, 16 }
  0x64   : > { %v3314_v51 = vrot.slane %v1765_v46, 1 }
  0x65   : > { %1133 = vrot.lane.b32.xlu1 %v1017_v39, %s2963_s5  ;;  %v225_v39 = vld [vmem:[%s3045_s30 + $0x90] sm:$0x1] }
  0x66   : > { %475 = vrot.lane.b32.xlu2 %v356_v49, %s2963_s5  ;;  %v1763_v49 = vor.u32 %v1761_v38, %v1759_v62  ;;  %v318_v58 = vunpack.c.l.b16 %v225_v39  ;;  %v461_v38 = vshrl.u32 %v3254_v59, 16 }
  0x68   : > { %v1768_v8 = vsel %vm320_vm1, %v1763_v49, %v3314_v51  ;;  %v319_v16 = vpack.c.b16 %v318_v58, %v318_v58  ;;  %v3371_v58 = vld [vmem:[%s3045_s30 + $0x80] sm:$0xff] }
  0x6a   : > { %576 = vrot.lane.b32.xlu0 %v541_v60, %s2962_s4  ;;  %v1025_v60 = vsel %vm320_vm1, %v1020_v41, %v1024_v47  ;;  %v465_v46 = vshll.u32 %v319_v16, 16  ;;  %v2773_v41 = vld [vmem:[%s4474_s1] sm:$0x30] }
  0x6d   : > { %552 = vrot.lane.b32.xlu1 %v517_v10, %s2962_s4  ;;  %v2791_v10 = vld [vmem:[%s4474_s1 + $0x8] sm:$0x30] }
  0x6e   : > { %1870 = vrot.lane.b32.xlu2 %v1760_v15, %s2963_s5  ;;  %v2642_v62 = vor.u32 %v2791_v10, %v2641_v44  ;;  %v1030_v15 = vshll.u32 %v3317_v57, 16  ;;  %v463_v10 = vor.u32 %v461_v38, %v3269_v17 }
  0x70   : > { %v1437_v53 = vsel %vm700_vm2, %v2642_v62, 0  ;;  %v467_v62 = vrot.slane %v465_v46, 1  ;;  %v1098_v46 = vshrl.u32 %v3371_v58, 16 }
  0x71   : > { %1446 = vmatpush.bf16.msra.mxu1 %v1437_v53 }
  0x72   : > { %1211 = vrot.lane.b32.xlu0 %v1176_v12, %s2962_s4  ;;  %v1915_v12 = vsel %vm508_vm0, %v1912_v30, %v1914_v61  ;;  %v3347_v30 = vrot.slane %v1030_v15, 1 }
  0x75   : > { %501 = vrot.lane.b32.xlu1 %v460_v21, %s2963_s5  ;;  %v518_v21 = vrot.slane %v3272_v19, 1 }
  0x76   : > { %578 = vrot.lane.b32.xlu2 %v543_v7, %s2962_s4  ;;  %v2809_v7 = vld [vmem:[%s4474_s1 + $0x10] sm:$0x30] }
  0x77   : > { %v2734_v6 = vor.u32 %v2809_v7, %v2733_v25  ;;  %v519_v37 = vsel %vm508_vm0, %v516_v55, %v518_v21  ;;  %v3392_v7 = vld [vmem:[%s3045_s30 + $0x78] sm:$0xff] }
  0x78   : > { %v3301_v40 = vpop.permute.xlu2 %1205 }
  0x79   : > { %v3350_v36 = vsel %vm700_vm2, %v2734_v6, 0 }
  0x7a   : > { %1948 = vrot.lane.b32.xlu0 %v1913_v34, %s2962_s4  ;;  %v544_v34 = vrot.slane %v319_v16, 1  ;;  %2182 = vmatpush.bf16.msra.mxu2 %v3350_v36  ;;  %v3383_v16 = vld [vmem:[%s3045_s30 + $0x88] sm:$0xff] }
  0x7c   : > { %v545_v55 = vsel %vm508_vm0, %v542_v20, %v544_v34  ;;  %v1179_v20 = vrot.slane %v3317_v57, 1 }
  0x7d   : > { %477 = vrot.lane.b32.xlu1 %v364_v11, %s2963_s5  ;;  %v1028_v11 = vor.u32 %v1026_v22, %v1024_v47  ;;  %v3368_v47 = vld [vmem:[%s3045_s30 + $0x30] sm:$0xff]  ;;  %v468_v22 = vsel %vm320_vm1, %v463_v10, %v467_v62 }
  0x7e   : > { %1213 = vrot.lane.b32.xlu2 %v1178_v28, %s2962_s4  ;;  %v2549_v28 = vld [vmem:[%s4474_s1] sm:$0xf]  ;;  %v369_v15 = vshll.u32 %v3368_v47, 16  ;;  %v520_v25 = vrot.slane %v3368_v47, 1  ;;  %v1180_v34 = vsel %vm508_vm0, %v1177_v35, %v1179_v20  ;;  %v1086_v35 = vshll.u32 %v3392_v7, 16 }
  0x7f   : > { %v2550_v49 = vor.u32 %v2773_v41, %v2549_v28  ;;  %v1033_v44 = vsel %vm320_vm1, %v1028_v11, %v3347_v30  ;;  %v1102_v28 = vshll.u32 %v3383_v16, 16 }
  0x80   : > { %v3327_v13 = vpop.permute.xlu2 %1127  ;;  %v371_v11 = vrot.slane %v369_v15, 1  ;;  %v521_v41 = vsel %vm508_vm0, %v518_v21, %v520_v25  ;;  %v3421_v15 = vrot.slane %v1086_v35, 1 }
  0x81   : > { %v3416_v10 = vrot.slane %v1102_v28, 1 }
  0x82   : > { %1135 = vrot.lane.b32.xlu0 %v1025_v60, %s2963_s5  ;;  %v702_v60 = vsel %vm700_vm2, %v2550_v49, 0  ;;  %v1769_v49 = vshrl.u32 %v3295_v23, 16 }
  0x83   : > { %711 = vmatpush.bf16.msra.mxu0 %v702_v60  ;;  %2817 = vmatpush.bf16.msra.mxu3 %v702_v60 }
  0x84   : > { %v1771_v21 = vor.u32 %v1769_v49, %v3314_v51 }
  0x85   : > { %1872 = vrot.lane.b32.xlu1 %v1768_v8, %s2963_s5  ;;  %v365_v8 = vshrl.u32 %v3272_v19, 16 }
  0x86   : > { %1950 = vrot.lane.b32.xlu2 %v1915_v12, %s2962_s4  ;;  %v1094_v12 = vshll.u32 %v3371_v58, 16 }
  0x87   : > { %2818 = vmatpush.bf16.msrb.mxu3 %v1437_v53  ;;  %v3389_v53 = vld [vmem:[%s3045_s30 + $0x50] sm:$0xff] }
  0x88   : > { %v1126_v39 = vpop.permute.xlu2 %1125  ;;  %v1096_v38 = vrot.slane %v1094_v12, 1  ;;  %v1090_v12 = vshrl.u32 %v3392_v7, 16 }
  0x89   : > { %v1242_v49 = vsel %vm582_vm3, %v3105_v50, %v1126_v39 }
  0x8a   : > { %554 = vrot.lane.b32.xlu0 %v519_v37, %s2962_s4  ;;  %v367_v37 = vor.u32 %v365_v8, %v3292_v26 }
  0x8c   : > { %v372_v26 = vsel %vm320_vm1, %v367_v37, %v371_v11 }
  0x8d   : > { %580 = vrot.lane.b32.xlu1 %v545_v55, %s2962_s4  ;;  %v1773_v55 = vshll.u32 %v3389_v53, 16 }
  0x8e   : > { %1137 = vrot.lane.b32.xlu2 %v1033_v44, %s2963_s5  ;;  %v1100_v44 = vor.u32 %v1098_v46, %v1096_v38  ;;  %v1092_v46 = vor.u32 %v1090_v12, %v3421_v15 }
  0x8f   : > { %v1941_v17 = vpop.permute.xlu1 %1940  ;;  %v3419_v8 = vrot.slane %v1773_v55, 1  ;;  %v3446_v55 = vld [vmem:[%s3045_s30 + $0x38] sm:$0xff] }
  0x90   : > { %v3394_v6 = vpop.permute.xlu2 %1942  ;;  %v1105_v37 = vsel %vm320_vm1, %v1100_v44, %v3416_v10 }
  0x91   : > { %v1776_v51 = vsel %vm320_vm1, %v1771_v21, %v3419_v8 }
  0x92   : > { %503 = vrot.lane.b32.xlu0 %v468_v22, %s2963_s5 }
  0x94   : > { %v3411_v60 = vpop.permute.xlu0 %469 }
  0x95   : > { %1215 = vrot.lane.b32.xlu1 %v1180_v34, %s2962_s4  ;;  %v1244_v34 = vsel %vm582_vm3, %v3054_v2, %v3327_v13  ;;  %v1195_v2 = vrot.slane %v3371_v58, 1  ;;  %v4478_v13 = vrot.slane %v3383_v16, 1 }
  0x96   : > { %556 = vrot.lane.b32.xlu2 %v521_v41, %s2962_s4  ;;  %v3437_v41 = vsel %vm619_vm4, %v1244_v34, %v3301_v40  ;;  %v4481_v40 = vrot.slane %v3389_v53, 1  ;;  %v4479_v34 = vrot.slane %v3392_v7, 1 }
  0x97   : > { %v1939_v62 = vpop.permute.xlu1 %1938  ;;  %v1341_v44 = vrot.slane %v3437_v41, 1 }
  0x98   : > { %v3424_v22 = vpop.permute.xlu2 %1207 }
  0x9a   : > { %479 = vrot.lane.b32.xlu0 %v372_v26, %s2963_s5  ;;  %v1097_v26 = vsel %vm320_vm1, %v1092_v46, %v1096_v38  ;;  %v1198_v38 = vsel %vm508_vm0, %v1195_v2, %v4478_v13 }
  0x9c   : > { %v1863_v28 = vpop.permute.xlu0 %1862 }
  0x9d   : > { %1155 = vrot.lane.b32.xlu1 %v1105_v37, %s2963_s5  ;;  %v1979_v21 = vsel %vm582_vm3, %v3048_v0, %v1863_v28  ;;  %v373_v37 = vshrl.u32 %v3368_v47, 16  ;;  %v1917_v0 = vsel %vm508_vm0, %v1914_v61, %v4481_v40  ;;  %v3472_v28 = vld [vmem:[%s3045_s30 + $0x48] sm:$0xff] }
  0x9e   : > { %1874 = vrot.lane.b32.xlu2 %v1776_v51, %s2963_s5  ;;  %v377_v51 = vshll.u32 %v3446_v55, 16  ;;  %v4480_v13 = vrot.slane %v3472_v28, 1 }
  0x9f   : > { %v1204_v35 = vpop.permute.xlu1 %1203 }
  0xa0   : > { %v1281_v50 = vsel %vm619_vm4, %v1242_v49, %v1204_v35  ;;  %v3452_v39 = vpop.permute.xlu2 %1944  ;;  %v3475_v49 = vsel %vm619_vm4, %v1979_v21, %v1941_v17  ;;  %v3486_v17 = vrot.slane %v377_v51, 1  ;;  %v1034_v21 = vshrl.u32 %v3317_v57, 16 }
  0xa1   : > { %v1340_v12 = vrot.slane %v1281_v50, 1  ;;  %v1196_v50 = vsel %vm508_vm0, %v4479_v34, %v1195_v2  ;;  %v1106_v51 = vshrl.u32 %v3383_v16, 16 }
  0xa2   : > { %1153 = vrot.lane.b32.xlu0 %v1097_v26, %s2963_s5 }
  0xa3   : > { %v1342_v46 = vsel %vm508_vm0, %v1340_v12, %v1341_v44  ;;  %v375_v12 = vor.u32 %v373_v37, %v371_v11  ;;  %v1036_v37 = vor.u32 %v1034_v21, %v3347_v30  ;;  %v584_v30 = vsel %vm582_vm3, %v3060_v4, %v3411_v60 }
  0xa4   : > { %v1861_v35 = vpop.permute.xlu0 %1860  ;;  %2643 = vmatmul.msk.bf16.vlgmr.msra.gmra.mxu1 %vm663_vm5, %v1342_v46  ;;  %v3490_v46 = vld [vmem:[%s3045_s30 + $0x90] sm:$0xff] }
  0xa5   : > { %v1977_v26 = vsel %vm582_vm3, %v3091_v32, %v1861_v35  ;;  %1233 = vrot.lane.b32.xlu1 %v1198_v38, %s2962_s4  ;;  %v2077_v32 = vrot.slane %v3475_v49, 2  ;;  %v1038_v38 = vshll.u32 %v3472_v28, 16  ;;  %v380_v11 = vsel %vm320_vm1, %v375_v12, %v3486_v17 }
  0xa6   : > { %v2016_v61 = vsel %vm619_vm4, %v1977_v26, %v1939_v62  ;;  %1952 = vrot.lane.b32.xlu2 %v1917_v0, %s2962_s4  ;;  %v3499_v0 = vld [vmem:[%s3045_s30 + $0x58] sm:$0xff]  ;;  %v1110_v49 = vshll.u32 %v3490_v46, 16  ;;  %v1199_v41 = vrot.slane %v3490_v46, 1 }
  0xa7   : > { %v2076_v35 = vrot.slane %v2016_v61, 2  ;;  %v1865_v52 = vpop.permute.xlu1 %1864  ;;  %v1040_v26 = vrot.slane %v1038_v38, 1  ;;  %v1182_v61 = vsel %vm508_vm0, %v1179_v20, %v4480_v13  ;;  %v1108_v38 = vor.u32 %v1106_v51, %v3416_v10 }
  0xa8   : > { %v3495_v2 = vpop.permute.xlu2 %1131  ;;  %v1981_v4 = vsel %vm582_vm3, %v3051_v1, %v1865_v52  ;;  %v522_v51 = vrot.slane %v3446_v55, 1 }
  0xa9   : > { %v2078_v62 = vsel %vm700_vm2, %v2076_v35, %v2077_v32  ;;  %v1781_v35 = vshll.u32 %v3499_v0, 16  ;;  %v1041_v34 = vsel %vm320_vm1, %v1036_v37, %v1040_v26  ;;  %v3540_v37 = vsel %vm619_vm4, %v1981_v4, %v3394_v6  ;;  %v3581_v4 = vld [vmem:[%s3045_s30 + $0x40] sm:$0xff] }
  0xaa   : > { %1231 = vrot.lane.b32.xlu0 %v1196_v50, %s2962_s4  ;;  %2735 = vmatmul.msk.bf16.vlgmr.msra.gmra.mxu2 %vm663_vm5, %v2078_v62  ;;  %v1777_v50 = vshrl.u32 %v3389_v53, 16  ;;  %v3522_v62 = vrot.slane %v1110_v49, 1  ;;  %v1042_v49 = vshrl.u32 %v3472_v28, 16  ;;  %v4482_v6 = vrot.slane %v3499_v0, 1 }
  0xab   : > { %v1783_v40 = vrot.slane %v1781_v35, 1 }
  0xac   : > { %v547_v12 = vpop.permute.xlu0 %546  ;;  %v1779_v13 = vor.u32 %v1777_v50, %v3419_v8  ;;  %v1113_v10 = vsel %vm320_vm1, %v1108_v38, %v3522_v62 }
  0xad   : > { %v621_v21 = vsel %vm619_vm4, %v584_v30, %v547_v12  ;;  %481 = vrot.lane.b32.xlu1 %v380_v11, %s2963_s5  ;;  %v3532_v11 = vld [vmem:[%s3045_s30 + $0x50] sm:$0xff]  ;;  %v1044_v30 = vor.u32 %v1042_v49, %v1040_v26  ;;  %v4488_v26 = vrot.slane %v3389_v53, 1 }
  0xae   : > { %2551 = vmatmul.msk.bf16.vlgmr.msra.gmra.mxu0 %vm663_vm5, %v621_v21  ;;  %1217 = vrot.lane.b32.xlu2 %v1182_v61, %s2962_s4  ;;  %v1784_v8 = vsel %vm320_vm1, %v1779_v13, %v1783_v40  ;;  %v1046_v1 = vshll.u32 %v3532_v11, 16 }
  0xaf   : > { %v472_v20 = vpop.permute.xlu1 %471  ;;  %v1919_v38 = vsel %vm508_vm0, %v4488_v26, %v4482_v6 }
  0xb0   : > { %v3529_v60 = vpop.permute.xlu2 %550  ;;  %v3559_v12 = vrot.slane %v1046_v1, 1  ;;  %v3591_v1 = vld [vmem:[%s3045_s30 + $0x60] sm:$0xff] }
  0xb2   : > { %1139 = vrot.lane.b32.xlu0 %v1041_v34, %s2963_s5  ;;  %v2079_v34 = vrot.slane %v3540_v37, 2  ;;  %v389_v37 = vshrl.u32 %v3581_v4, 16 }
  0xb4   : > { %v1130_v52 = vpop.permute.xlu0 %1129 }
  0xb5   : > { %v1246_v61 = vsel %vm582_vm3, %v3057_v3, %v1130_v52  ;;  %1157 = vrot.lane.b32.xlu1 %v1113_v10, %s2963_s5  ;;  %v523_v3 = vsel %vm508_vm0, %v520_v25, %v522_v51  ;;  %v2080_v25 = vsel %vm700_vm2, %v2077_v32, %v2079_v34  ;;  %v1049_v10 = vsel %vm320_vm1, %v1044_v30, %v3559_v12 }
  0xb6   : > { %v3551_v50 = vsel %vm619_vm4, %v1246_v61, %v3424_v22  ;;  %1876 = vrot.lane.b32.xlu2 %v1784_v8, %s2963_s5  ;;  %v586_v8 = vsel %vm582_vm3, %v3063_v5, %v472_v20  ;;  %v4484_v52 = vrot.slane %v3532_v11, 1  ;;  %v4489_v30 = vrot.slane %v3383_v16, 1 }
  0xb7   : > { %v4483_v13 = vrot.slane %v3551_v50, 1  ;;  %v1867_v35 = vpop.permute.xlu1 %1866  ;;  %v381_v5 = vshrl.u32 %v3446_v55, 16  ;;  %v385_v20 = vshll.u32 %v3581_v4, 16 }
  0xb8   : > { %v3561_v21 = vpop.permute.xlu2 %499  ;;  %v1983_v26 = vsel %vm582_vm3, %v3112_v54, %v1867_v35 }
  0xb9   : > { %v1344_v22 = vsel %vm508_vm0, %v1341_v44, %v4483_v13  ;;  %v876_v44 = vld [vmem:[%s3045_s30 + $0x98] sm:$0x3]  ;;  %v3618_v54 = vsel %vm619_vm4, %v1983_v26, %v3452_v39  ;;  %v383_v35 = vor.u32 %v381_v5, %v3486_v17 }
  0xba   : > { %558 = vrot.lane.b32.xlu0 %v523_v3, %s2962_s4  ;;  %2644 = vmatmul.msk.bf16.gmra.mxu1 %vm663_vm5, %v1344_v22  ;;  %v972_v61 = vunpack.c.l.b16 %v876_v44  ;;  %v1200_v22 = vsel %vm508_vm0, %v4489_v30, %v1199_v41  ;;  %v1785_v44 = vshrl.u32 %v3499_v0, 16  ;;  %v387_v30 = vrot.slane %v385_v20, 1  ;;  %v3634_v20 = vld [vmem:[%s3045_s30 + $0x58] sm:$0xff] }
  0xbb   : > { %2736 = vmatmul.msk.bf16.gmra.mxu2 %vm663_vm5, %v2080_v25  ;;  %v524_v25 = vrot.slane %v3581_v4, 1  ;;  %v2081_v39 = vrot.slane %v3618_v54, 2 }
  0xbc   : > { %v549_v32 = vpop.permute.xlu0 %548 }
  0xbd   : > { %v623_v49 = vsel %vm619_vm4, %v586_v8, %v549_v32  ;;  %1954 = vrot.lane.b32.xlu1 %v1919_v38, %s2962_s4  ;;  %v4490_v8 = vrot.slane %v3472_v28, 1 }
  0xbe   : > { %2552 = vmatmul.msk.bf16.gmra.mxu0 %vm663_vm5, %v623_v49  ;;  %1141 = vrot.lane.b32.xlu2 %v1049_v10, %s2963_s5  ;;  %v1789_v10 = vshll.u32 %v3591_v1, 16  ;;  %v3614_v49 = vpack.c.b16 %v972_v61, %v972_v61 }
  0xbf   : > { %v575_v3 = vpop.permute.xlu1 %574  ;;  %v1184_v32 = vsel %vm508_vm0, %v4490_v8, %v4484_v52  ;;  %v1787_v8 = vor.u32 %v1785_v44, %v1783_v40  ;;  %v1114_v52 = vshrl.u32 %v3490_v46, 16 }
  0xc0   : > { %v3604_v38 = vpop.permute.xlu2 %475  ;;  %v3627_v61 = vrot.slane %v1789_v10, 1  ;;  %v1118_v5 = vshll.u32 %v3614_v49, 16  ;;  %v1201_v26 = vrot.slane %v3614_v49, 1 }
  0xc2   : > { %1235 = vrot.lane.b32.xlu0 %v1200_v22, %s2962_s4  ;;  %v525_v22 = vsel %vm508_vm0, %v522_v51, %v524_v25  ;;  %v1248_v51 = vsel %vm582_vm3, %v3139_v24, %v3495_v2  ;;  %v1792_v10 = vsel %vm320_vm1, %v1787_v8, %v3627_v61  ;;  %v1116_v24 = vor.u32 %v1114_v52, %v3522_v62  ;;  %v3654_v2 = vld [vmem:[%s3045_s30 + $0x48] sm:$0xff] }
  0xc3   : > { %v1120_v54 = vrot.slane %v1118_v5, 1  ;;  %v1202_v52 = vsel %vm508_vm0, %v1199_v41, %v1201_v26 }
  0xc4   : > { %v498_v6 = vpop.permute.xlu0 %497 }
  0xc5   : > { %v612_v13 = vsel %vm582_vm3, %v3167_v43, %v498_v6  ;;  %1219 = vrot.lane.b32.xlu1 %v1184_v32, %s2962_s4  ;;  %v388_v6 = vsel %vm320_vm1, %v383_v35, %v387_v30  ;;  %v2082_v32 = vsel %vm700_vm2, %v2079_v34, %v2081_v39  ;;  %v1050_v35 = vshrl.u32 %v3532_v11, 16 }
  0xc6   : > { %v649_v17 = vsel %vm619_vm4, %v612_v13, %v575_v3  ;;  %560 = vrot.lane.b32.xlu2 %v525_v22, %s2962_s4  ;;  %v4491_v22 = vrot.slane %v3551_v50, 1  ;;  %v393_v34 = vshll.u32 %v3654_v2, 16 }
  0xc7   : > { %2565 = vmatmul.msk.bf16.vlgmr.msra.gmra.mxu3 %vm663_vm5, %v649_v17  ;;  %v1210_v40 = vpop.permute.xlu1 %1209  ;;  %v1052_v5 = vor.u32 %v1050_v35, %v3559_v12 }
  0xc8   : > { %v3643_v44 = vpop.permute.xlu2 %1870  ;;  %v3646_v13 = vsel %vm619_vm4, %v1248_v51, %v1210_v40  ;;  %2819 = vmatpush.bf16.msra.mxu3 %v3350_v36  ;;  %v1054_v36 = vshll.u32 %v3634_v20, 16  ;;  %v1121_v40 = vsel %vm320_vm1, %v1116_v24, %v1120_v54  ;;  %v526_v24 = vrot.slane %v3654_v2, 1 }
  0xc9   : > { %v1345_v3 = vrot.slane %v3646_v13, 1 }
  0xca   : > { %483 = vrot.lane.b32.xlu0 %v388_v6, %s2963_s5  ;;  %v3680_v51 = vrot.slane %v1054_v36, 1  ;;  %v391_v6 = vor.u32 %v389_v37, %v387_v30  ;;  %v1122_v36 = vshrl.u32 %v3614_v49, 16  ;;  %v4492_v37 = vrot.slane %v3499_v0, 1 }
  0xcb   : > { %2737 = vmatmul.msk.bf16.gmra.mxu2 %vm663_vm5, %v2082_v32  ;;  %v1346_v62 = vsel %vm508_vm0, %v4491_v22, %v1345_v3  ;;  %v395_v32 = vrot.slane %v393_v34, 1 }
  0xcc   : > { %v474_v8 = vpop.permute.xlu0 %473  ;;  %2645 = vmatmul.msk.bf16.gmra.mxu1 %vm663_vm5, %v1346_v62 }
  0xcd   : > { %v588_v17 = vsel %vm582_vm3, %v3126_v14, %v474_v8  ;;  %1878 = vrot.lane.b32.xlu1 %v1792_v10, %s2963_s5  ;;  %v1057_v14 = vsel %vm320_vm1, %v1052_v5, %v3680_v51  ;;  %v396_v12 = vsel %vm320_vm1, %v391_v6, %v395_v32  ;;  %v1185_v5 = vrot.slane %v3634_v20, 1 }
  0xce   : > { %v625_v50 = vsel %vm619_vm4, %v588_v17, %v3529_v60  ;;  %1237 = vrot.lane.b32.xlu2 %v1202_v52, %s2962_s4  ;;  %v1920_v60 = vrot.slane %v3591_v1, 1  ;;  %v527_v17 = vsel %vm508_vm0, %v524_v25, %v526_v24  ;;  %v590_v25 = vsel %vm582_vm3, %v3197_v63, %v3604_v38 }
  0xcf   : > { %2553 = vmatmul.msk.bf16.gmra.mxu0 %vm663_vm5, %v625_v50  ;;  %v1947_v41 = vpop.permute.xlu1 %1946  ;;  %v1124_v50 = vor.u32 %v1122_v36, %v1120_v54  ;;  %v397_v38 = vshrl.u32 %v3654_v2, 16 }
  0xd0   : > { %v3685_v22 = vpop.permute.xlu2 %578 }
  0xd2   : > { %1159 = vrot.lane.b32.xlu0 %v1121_v40, %s2963_s5  ;;  %v614_v40 = vsel %vm582_vm3, %v3174_v45, %v3561_v21  ;;  %v1793_v21 = vshrl.u32 %v3591_v1, 16 }
  0xd4   : > { %v1869_v10 = vpop.permute.xlu0 %1868 }
  0xd5   : > { %v1985_v35 = vsel %vm582_vm3, %v3145_v27, %v1869_v10  ;;  %1143 = vrot.lane.b32.xlu1 %v1057_v14, %s2963_s5  ;;  %v1921_v27 = vsel %vm508_vm0, %v4492_v37, %v1920_v60  ;;  %v3727_v14 = vld [vmem:[%s3045_s30 + $0x50] sm:$0xff] }
  0xd6   : > { %v3696_v30 = vsel %vm619_vm4, %v1985_v35, %v1947_v41  ;;  %485 = vrot.lane.b32.xlu2 %v396_v12, %s2963_s5  ;;  %v3719_v41 = vld [vmem:[%s3045_s30 + $0x68] sm:$0xff]  ;;  %v4493_v12 = vrot.slane %v3532_v11, 1  ;;  %v401_v37 = vshll.u32 %v3727_v14, 16 }
  0xd7   : > { %v2083_v62 = vrot.slane %v3696_v30, 2  ;;  %v1134_v52 = vpop.permute.xlu1 %1133  ;;  %v1797_v10 = vshll.u32 %v3719_v41, 16  ;;  %v1922_v35 = vrot.slane %v3719_v41, 1  ;;  %v1801_v13 = vshrl.u32 %v3719_v41, 16 }
  0xd8   : > { %v3705_v34 = vpop.permute.xlu2 %1213  ;;  %v1186_v45 = vsel %vm508_vm0, %v4493_v12, %v1185_v5 }
  0xd9   : > { %v2084_v8 = vsel %vm700_vm2, %v2081_v39, %v2083_v62 }
  0xda   : > { %1956 = vrot.lane.b32.xlu0 %v1921_v27, %s2962_s4  ;;  %v3748_v27 = vld [vmem:[%s3045_s30 + $0x60] sm:$0xff] }
  0xdb   : > { %2738 = vmatmul.msk.bf16.gmra.mxu2 %vm663_vm5, %v2084_v8  ;;  %v1795_v8 = vor.u32 %v1793_v21, %v3627_v61  ;;  %v3765_v61 = vrot.slane %v401_v37, 1  ;;  %v1187_v49 = vrot.slane %v3748_v27, 1  ;;  %v3790_v37 = vld [vmem:[%s3045_s30 + $0x88] sm:$0xff] }
  0xdc   : > { %v577_v39 = vpop.permute.xlu0 %576 }
  0xdd   : > { %v651_v6 = vsel %vm619_vm4, %v614_v40, %v577_v39  ;;  %562 = vrot.lane.b32.xlu1 %v527_v17, %s2962_s4  ;;  %v1799_v17 = vrot.slane %v1797_v10, 1  ;;  %v1250_v40 = vsel %vm582_vm3, %v3164_v42, %v1134_v52  ;;  %v1062_v42 = vshll.u32 %v3748_v27, 16  ;;  %v3771_v52 = vld [vmem:[%s3045_s30 + $0x70] sm:$0xff] }
  0xde   : > { %2566 = vmatmul.msk.bf16.gmra.mxu3 %vm663_vm5, %v651_v6  ;;  %1161 = vrot.lane.b32.xlu2 %v1124_v50, %s2963_s5  ;;  %v1923_v50 = vsel %vm508_vm0, %v1920_v60, %v1922_v35  ;;  %v3757_v6 = vld [vmem:[%s3045_s30 + $0x80] sm:$0xff]  ;;  %v1058_v60 = vshrl.u32 %v3634_v20, 16 }
  0xdf   : > { %v553_v54 = vpop.permute.xlu1 %552  ;;  %v1800_v21 = vsel %vm320_vm1, %v1795_v8, %v1799_v17 }
  0xe0   : > { %v3740_v36 = vpop.permute.xlu2 %1950  ;;  %v627_v63 = vsel %vm619_vm4, %v590_v25, %v553_v54  ;;  %v399_v54 = vor.u32 %v397_v38, %v395_v32  ;;  %v1060_v8 = vor.u32 %v1058_v60, %v3680_v51  ;;  %v1987_v51 = vsel %vm582_vm3, %v3216_v18, %v3643_v44 }
  0xe1   : > { %2554 = vmatmul.msk.bf16.gmra.mxu0 %vm663_vm5, %v627_v63 }
  0xe2   : > { %1221 = vrot.lane.b32.xlu0 %v1186_v45, %s2962_s4  ;;  %v404_v38 = vsel %vm320_vm1, %v399_v54, %v3765_v61  ;;  %v1825_v54 = vshrl.u32 %v3757_v6, 16 }
  0xe4   : > { %v1212_v39 = vpop.permute.xlu0 %1211 }
  0xe5   : > { %v3760_v25 = vsel %vm619_vm4, %v1250_v40, %v1212_v39  ;;  %1239 = vrot.lane.b32.xlu1 %v1201_v26, %s2962_s4  ;;  %v1821_v26 = vshll.u32 %v3757_v6, 16  ;;  %v1188_v40 = vsel %vm508_vm0, %v1185_v5, %v1187_v49  ;;  %v1803_v5 = vor.u32 %v1801_v13, %v1799_v17 }
  0xe6   : > { %v1347_v12 = vrot.slane %v3760_v25, 1  ;;  %1958 = vrot.lane.b32.xlu2 %v1923_v50, %s2962_s4  ;;  %v3794_v50 = vrot.slane %v1062_v42, 1  ;;  %v528_v13 = vrot.slane %v3727_v14, 1 }
  0xe7   : > { %v502_v45 = vpop.permute.xlu1 %501  ;;  %v3803_v39 = vrot.slane %v1821_v26, 1 }
  0xe8   : > { %v1348_v32 = vsel %vm508_vm0, %v1345_v3, %v1347_v12  ;;  %v3782_v10 = vpop.permute.xlu2 %1137  ;;  %v616_v63 = vsel %vm582_vm3, %v3203_v9, %v502_v45  ;;  %v1805_v3 = vshll.u32 %v3771_v52, 16  ;;  %v1829_v45 = vshll.u32 %v3790_v37, 16 }
  0xe9   : > { %2646 = vmatmul.msk.bf16.gmra.mxu1 %vm663_vm5, %v1348_v32  ;;  %v653_v9 = vsel %vm619_vm4, %v616_v63, %v3685_v22  ;;  %v1065_v18 = vsel %vm320_vm1, %v1060_v8, %v3794_v50  ;;  %v1827_v44 = vor.u32 %v1825_v54, %v3803_v39  ;;  %v3830_v8 = vld [vmem:[%s3045_s30 + $0x90] sm:$0xff]  ;;  %v1924_v54 = vrot.slane %v3771_v52, 1 }
  0xea   : > { %1880 = vrot.lane.b32.xlu0 %v1800_v21, %s2963_s5  ;;  %v3813_v21 = vrot.slane %v1805_v3, 1  ;;  %v1831_v17 = vrot.slane %v1829_v45, 1  ;;  %v1928_v45 = vrot.slane %v3757_v6, 1 }
  0xec   : > { %v1949_v60 = vpop.permute.xlu0 %1948  ;;  %v1832_v3 = vsel %vm320_vm1, %v1827_v44, %v1831_v17 }
  0xed   : > { %v2026_v42 = vsel %vm619_vm4, %v1987_v51, %v1949_v60  ;;  %487 = vrot.lane.b32.xlu1 %v404_v38, %s2963_s5  ;;  %v1808_v38 = vsel %vm320_vm1, %v1803_v5, %v3813_v21  ;;  %v3847_v51 = vld [vmem:[%s3045_s30 + $0x68] sm:$0xff] }
  0xee   : > { %v2085_v22 = vrot.slane %v2026_v42, 2  ;;  %2567 = vmatmul.msk.bf16.gmra.mxu3 %vm663_vm5, %v653_v9  ;;  %1223 = vrot.lane.b32.xlu2 %v1188_v40, %s2962_s4  ;;  %v529_v40 = vsel %vm508_vm0, %v526_v24, %v528_v13  ;;  %v1833_v42 = vshrl.u32 %v3790_v37, 16 }
  0xef   : > { %v478_v26 = vpop.permute.xlu1 %477 }
  0xf0   : > { %v2086_v32 = vsel %vm700_vm2, %v2083_v62, %v2085_v22  ;;  %v3822_v63 = vpop.permute.xlu2 %556 }
  0xf1   : > { %2739 = vmatmul.msk.bf16.gmra.mxu2 %vm663_vm5, %v2086_v32  ;;  %v1930_v32 = vrot.slane %v3790_v37, 1 }
  0xf2   : > { %1145 = vrot.lane.b32.xlu0 %v1065_v18, %s2963_s5 }
  0xf4   : > { %v1136_v30 = vpop.permute.xlu0 %1135 }
  0xf5   : > { %v1252_v62 = vsel %vm582_vm3, %v3223_v29, %v1136_v30  ;;  %1882 = vrot.lane.b32.xlu1 %v1808_v38, %s2963_s5  ;;  %v1070_v38 = vshll.u32 %v3847_v51, 16  ;;  %v1931_v30 = vsel %vm508_vm0, %v1928_v45, %v1930_v32 }
  0xf6   : > { %v3838_v9 = vsel %vm619_vm4, %v1252_v62, %v3705_v34  ;;  %1888 = vrot.lane.b32.xlu2 %v1832_v3, %s2963_s5  ;;  %v1837_v34 = vshll.u32 %v3830_v8, 16  ;;  %v1835_v3 = vor.u32 %v1833_v42, %v1831_v17  ;;  %v592_v62 = vsel %vm582_vm3, %v3229_v33, %v478_v26 }
  0xf7   : > { %v1349_v29 = vrot.slane %v3838_v9, 1  ;;  %v1873_v60 = vpop.permute.xlu1 %1872  ;;  %v405_v26 = vshrl.u32 %v3727_v14, 16 }
  0xf8   : > { %v1875_v5 = vpop.permute.xlu2 %1874  ;;  %v1989_v24 = vsel %vm582_vm3, %v3242_v48, %v1873_v60  ;;  %v1925_v48 = vsel %vm508_vm0, %v1922_v35, %v1924_v54  ;;  %v3875_v25 = vrot.slane %v1837_v34, 1  ;;  %v3891_v34 = vrot.slane %v1070_v38, 1  ;;  %v3905_v38 = vld [vmem:[%s3045_s30 + $0x78] sm:$0xff] }
  0xf9   : > { %v3858_v18 = vsel %vm619_vm4, %v1989_v24, %v3740_v36  ;;  %v1350_v44 = vsel %vm508_vm0, %v1347_v12, %v1349_v29  ;;  %v1066_v36 = vshrl.u32 %v3748_v27, 16  ;;  %v3878_v12 = vld [vmem:[%s3045_s30 + $0x58] sm:$0xff] }
  0xfa   : > { %564 = vrot.lane.b32.xlu0 %v529_v40, %s2962_s4  ;;  %2647 = vmatmul.msk.bf16.gmra.mxu1 %vm663_vm5, %v1350_v44  ;;  %v2087_v40 = vrot.slane %v3858_v18, 2  ;;  %v409_v17 = vshll.u32 %v3878_v12, 16  ;;  %v1840_v33 = vsel %vm320_vm1, %v1835_v3, %v3875_v25 }
  0xfb   : > { %v1068_v42 = vor.u32 %v1066_v36, %v3794_v50  ;;  %v1932_v36 = vrot.slane %v3830_v8, 1 }
  0xfc   : > { %v555_v60 = vpop.permute.xlu0 %554  ;;  %v2088_v18 = vsel %vm700_vm2, %v2085_v22, %v2087_v40 }
  0xfd   : > { %v629_v35 = vsel %vm619_vm4, %v592_v62, %v555_v60  ;;  %1960 = vrot.lane.b32.xlu1 %v1925_v48, %s2962_s4  ;;  %v411_v48 = vrot.slane %v409_v17, 1  ;;  %v407_v62 = vor.u32 %v405_v26, %v3765_v61  ;;  %v1073_v50 = vsel %vm320_vm1, %v1068_v42, %v3891_v34 }
  0xfe   : > { %2555 = vmatmul.msk.bf16.gmra.mxu0 %vm663_vm5, %v629_v35  ;;  %1966 = vrot.lane.b32.xlu2 %v1931_v30, %s2962_s4  ;;  %v1813_v60 = vshll.u32 %v3905_v38, 16  ;;  %v1991_v61 = vsel %vm582_vm3, %v3295_v23, %v1875_v5  ;;  %v530_v17 = vrot.slane %v3878_v12, 1  ;;  %v1254_v42 = vsel %vm582_vm3, %v3288_v31, %v3782_v10 }
  0xff   : > { %v581_v24 = vpop.permute.xlu1 %580  ;;  %v412_v3 = vsel %vm320_vm1, %v407_v62, %v411_v48  ;;  %v1809_v26 = vshrl.u32 %v3771_v52, 16 }
 0x100   : > { %v1953_v44 = vpop.permute.xlu2 %1952  ;;  %v3932_v62 = vrot.slane %v1813_v60, 1  ;;  %v531_v10 = vsel %vm508_vm0, %v528_v13, %v530_v17 }
 0x101   : > { %2740 = vmatmul.msk.bf16.gmra.mxu2 %vm663_vm5, %v2088_v18  ;;  %v1811_v31 = vor.u32 %v1809_v26, %v3813_v21 }
 0x102   : > { %1890 = vrot.lane.b32.xlu0 %v1840_v33, %s2963_s5  ;;  %v1933_v33 = vsel %vm508_vm0, %v1930_v32, %v1932_v36 }
 0x103   : > { %v1816_v21 = vsel %vm320_vm1, %v1811_v31, %v3932_v62 }
 0x104   : > { %v504_v30 = vpop.permute.xlu0 %503 }
 0x105   : > { %v618_v22 = vsel %vm582_vm3, %v3254_v59, %v504_v30  ;;  %1147 = vrot.lane.b32.xlu1 %v1073_v50, %s2963_s5  ;;  %v3948_v50 = vld [vmem:[%s3045_s30 + $0x98] sm:$0xff] }
 0x106   : > { %v655_v35 = vsel %vm619_vm4, %v618_v22, %v581_v24  ;;  %489 = vrot.lane.b32.xlu2 %v412_v3, %s2963_s5  ;;  %v3929_v24 = vsel %vm619_vm4, %v1991_v61, %v1953_v44  ;;  %v1189_v44 = vrot.slane %v3847_v51, 1  ;;  %v3961_v22 = vld [vmem:[%s3045_s30 + $0x60] sm:$0xff] }
 0x107   : > { %2568 = vmatmul.msk.bf16.gmra.mxu3 %vm663_vm5, %v655_v35  ;;  %v1216_v59 = vpop.permute.xlu1 %1215  ;;  %v4485_v3 = vrot.slane %v3929_v24, 2  ;;  %v1845_v35 = vshll.u32 %v3948_v50, 16  ;;  %v417_v26 = vshll.u32 %v3961_v22, 16 }
 0x108   : > { %v3924_v23 = vsel %vm619_vm4, %v1254_v42, %v1216_v59  ;;  %v3926_v5 = vpop.permute.xlu2 %1217  ;;  %v1190_v61 = vsel %vm508_vm0, %v1187_v49, %v1189_v44  ;;  %v1934_v59 = vrot.slane %v3948_v50, 1 }
 0x109   : > { %v1351_v18 = vrot.slane %v3924_v23, 1  ;;  %v1847_v31 = vrot.slane %v1845_v35, 1 }
 0x10a   : > { %1968 = vrot.lane.b32.xlu0 %v1933_v33, %s2962_s4  ;;  %v413_v33 = vshrl.u32 %v3878_v12, 16 }
 0x10b   : > { %v1352_v32 = vsel %vm508_vm0, %v1349_v29, %v1351_v18  ;;  %v1926_v29 = vrot.slane %v3905_v38, 1 }
 0x10c   : > { %v480_v30 = vpop.permute.xlu0 %479  ;;  %2648 = vmatmul.msk.bf16.gmra.mxu1 %vm663_vm5, %v1352_v32  ;;  %v1935_v32 = vsel %vm508_vm0, %v1932_v36, %v1934_v59 }
 0x10d   : > { %v594_v13 = vsel %vm582_vm3, %v3272_v19, %v480_v30  ;;  %566 = vrot.lane.b32.xlu1 %v531_v10, %s2962_s4  ;;  %v1841_v19 = vshrl.u32 %v3830_v8, 16  ;;  %v1927_v49 = vsel %vm508_vm0, %v1924_v54, %v1926_v29  ;;  %v3987_v10 = vld [vmem:[%s3045_s30 + $0x70] sm:$0xff]  ;;  %v1611_v30 = vld [vmem:[%s3045_s30 + $0xa0] sm:$0x7]  ;;  %v1074_v54 = vshrl.u32 %v3847_v51, 16 }
 0x10e   : > { %v631_v9 = vsel %vm619_vm4, %v594_v13, %v3822_v63  ;;  %1884 = vrot.lane.b32.xlu2 %v1816_v21, %s2963_s5  ;;  %v2090_v63 = vsel %vm700_vm2, %v2087_v40, %v4485_v3  ;;  %v415_v13 = vor.u32 %v413_v33, %v411_v48  ;;  %v1707_v35 = vunpack.c.l.b16 %v1611_v30 }
 0x10f   : > { %2556 = vmatmul.msk.bf16.gmra.mxu0 %vm663_vm5, %v631_v9  ;;  %v1156_v60 = vpop.permute.xlu1 %1155  ;;  %v1843_v40 = vor.u32 %v1841_v19, %v3875_v25  ;;  %v3994_v9 = vrot.slane %v417_v26, 1  ;;  %v1078_v19 = vshll.u32 %v3987_v10, 16  ;;  %v1191_v36 = vrot.slane %v3987_v10, 1 }
 0x110   : > { %v3973_v42 = vpop.permute.xlu2 %1876  ;;  %v1076_v33 = vor.u32 %v1074_v54, %v3891_v34  ;;  %v1817_v26 = vshrl.u32 %v3905_v38, 16  ;;  %v4013_v30 = vpack.c.b16 %v1707_v35, %v1707_v35 }
 0x111   : > { %2741 = vmatmul.msk.bf16.gmra.mxu2 %vm663_vm5, %v2090_v63  ;;  %v1848_v25 = vsel %vm320_vm1, %v1843_v40, %v1847_v31  ;;  %v420_v48 = vsel %vm320_vm1, %v415_v13, %v3994_v9  ;;  %v1192_v3 = vsel %vm508_vm0, %v1189_v44, %v1191_v36 }
 0x112   : > { %1225 = vrot.lane.b32.xlu0 %v1190_v61, %s2962_s4  ;;  %v1853_v34 = vshll.u32 %v4013_v30, 16 }
 0x114   : > { %v1154_v21 = vpop.permute.xlu0 %1153 }
 0x115   : > { %1962 = vrot.lane.b32.xlu1 %v1927_v49, %s2962_s4  ;;  %v1272_v49 = vsel %vm582_vm3, %v3371_v58, %v1156_v60  ;;  %v1270_v58 = vsel %vm582_vm3, %v3392_v7, %v1154_v21  ;;  %v1849_v21 = vshrl.u32 %v3948_v50, 16 }
 0x116   : > { %1970 = vrot.lane.b32.xlu2 %v1935_v32, %s2962_s4  ;;  %v1080_v32 = vrot.slane %v1078_v19, 1 }
 0x117   : > { %v1234_v61 = vpop.permute.xlu1 %1233 }
 0x118   : > { %v4000_v63 = vpop.permute.xlu2 %1141  ;;  %v4011_v40 = vsel %vm619_vm4, %v1272_v49, %v1234_v61  ;;  %v1081_v19 = vsel %vm320_vm1, %v1076_v33, %v1080_v32  ;;  %v532_v33 = vrot.slane %v3961_v22, 1 }
 0x119   : > { %v1369_v54 = vrot.slane %v4011_v40, 1 }
 0x11a   : > { %1892 = vrot.lane.b32.xlu0 %v1848_v25, %s2963_s5  ;;  %v1819_v25 = vor.u32 %v1817_v26, %v3932_v62  ;;  %v1851_v62 = vor.u32 %v1849_v21, %v1847_v31  ;;  %v1082_v21 = vshrl.u32 %v3987_v10, 16 }
 0x11c   : > { %v1232_v60 = vpop.permute.xlu0 %1231 }
 0x11d   : > { %v4021_v13 = vsel %vm619_vm4, %v1270_v58, %v1232_v60  ;;  %491 = vrot.lane.b32.xlu1 %v420_v48, %s2963_s5  ;;  %v4039_v48 = vrot.slane %v1853_v34, 1  ;;  %v1936_v34 = vrot.slane %v4013_v30, 1 }
 0x11e   : > { %v1367_v61 = vrot.slane %v4021_v13, 1  ;;  %1227 = vrot.lane.b32.xlu2 %v1192_v3, %s2962_s4  ;;  %v1824_v3 = vsel %vm320_vm1, %v1819_v25, %v3803_v39 }
 0x11f   : > { %v482_v44 = vpop.permute.xlu1 %481  ;;  %v1856_v26 = vsel %vm320_vm1, %v1851_v62, %v4039_v48 }
 0x120   : > { %v1370_v35 = vsel %vm508_vm0, %v1367_v61, %v1369_v54  ;;  %v4036_v49 = vpop.permute.xlu2 %560 }
 0x121   : > { %2657 = vmatmul.msk.bf16.vlgmr.msrb.gmra.mxu3 %vm663_vm5, %v1370_v35  ;;  %v1448_v39 = vpop.f32.mrf.mxu1 }
 0x122   : > { %1149 = vrot.lane.b32.xlu0 %v1081_v19, %s2963_s5 }
 0x124   : > { %v1140_v58 = vpop.permute.xlu0 %1139 }
 0x125   : > { %v1256_v60 = vsel %vm582_vm3, %v3317_v57, %v1140_v58  ;;  %1886 = vrot.lane.b32.xlu1 %v1824_v3, %s2963_s5  ;;  %v533_v57 = vsel %vm508_vm0, %v530_v17, %v532_v33  ;;  %v1084_v3 = vor.u32 %v1082_v21, %v1080_v32  ;;  %v1937_v17 = vsel %vm508_vm0, %v1934_v59, %v1936_v34  ;;  %v4082_v58 = vld [vmem:[%s3045_s30 + $0x68] sm:$0xff] }
 0x126   : > { %v4052_v31 = vsel %vm619_vm4, %v1256_v60, %v3926_v5  ;;  %1894 = vrot.lane.b32.xlu2 %v1856_v26, %s2963_s5  ;;  %v4064_v5 = vld [vmem:[%s4475_s2] ss:$0 sm:$0xff] }
 0x127   : > { %v1353_v25 = vrot.slane %v4052_v31, 1  ;;  %v1158_v19 = vpop.permute.xlu1 %1157  ;;  %v1089_v23 = vsel %vm320_vm1, %v1084_v3, %v3421_v15  ;;  %v1993_v15 = vsel %vm582_vm3, %v3389_v53, %v3973_v42  ;;  %v425_v3 = vshll.u32 %v4082_v58, 16 }
 0x128   : > { %v4071_v62 = vpop.permute.xlu2 %1237  ;;  %v534_v53 = vrot.slane %v4082_v58, 1 }
 0x129   : > { %v1354_v35 = vsel %vm508_vm0, %v1351_v18, %v1353_v25  ;;  %v596_v18 = vsel %vm582_vm3, %v3368_v47, %v482_v44  ;;  %v1929_v44 = vsel %vm508_vm0, %v1926_v29, %v1928_v45 }
 0x12a   : > { %568 = vrot.lane.b32.xlu0 %v533_v57, %s2962_s4  ;;  %2649 = vmatmul.msk.bf16.gmra.mxu1 %vm663_vm5, %v1354_v35  ;;  %v421_v35 = vshrl.u32 %v3961_v22, 16 }
 0x12b   : > { %v713_v26 = vpop.f32.mrf.mxu0 }
 0x12c   : > { %v803_v32 = vadd.f32 %v4064_v5, %v713_v26  ;;  %v559_v60 = vpop.permute.xlu0 %558  ;;  %v1450_v26 = vpop.f32.mrf.mxu1 }
 0x12d   : > { %v2184_v57 = vpop.f32.mrf.mxu2  ;;  %v633_v21 = vsel %vm619_vm4, %v596_v18, %v559_v60  ;;  %1972 = vrot.lane.b32.xlu1 %v1937_v17, %s2962_s4  ;;  %v4494_v18 = vrot.slane %v3392_v7, 1  ;;  %v535_v7 = vsel %vm508_vm0, %v532_v33, %v534_v53 }
 0x12e   : > { %v1538_v59 = vadd.f32 %v1448_v39, %v803_v32  ;;  %2557 = vmatmul.msk.bf16.gmra.mxu0 %vm663_vm5, %v633_v21  ;;  %1151 = vrot.lane.b32.xlu2 %v1089_v23, %s2963_s5  ;;  %v4495_v32 = vrot.slane %v3929_v24, 2  ;;  %v427_v21 = vrot.slane %v425_v3, 1 }
 0x12f   : > { %v1955_v47 = vpop.permute.xlu1 %1954  ;;  %v1194_v45 = vsel %vm508_vm0, %v1191_v36, %v4494_v18 }
 0x130   : > { %v2274_v39 = vadd.f32 %v2184_v57, %v1538_v59  ;;  %v4106_v17 = vsel %vm619_vm4, %v1993_v15, %v1955_v47  ;;  %v423_v57 = vor.u32 %v421_v35, %v3994_v9  ;;  %v4122_v59 = vpop.permute.xlu2 %485  ;;  %v1274_v15 = vsel %vm582_vm3, %v3383_v16, %v1158_v19 }
 0x131   : > { %v2091_v23 = vrot.slane %v4106_v17, 2  ;;  %v1258_v16 = vsel %vm582_vm3, %v3472_v28, %v4000_v63  ;;  %v1857_v28 = vshrl.u32 %v4013_v30, 16 }
 0x132   : > { %v2310_v42 = vmax.f32 %v2274_v39, 0.0  ;;  %1964 = vrot.lane.b32.xlu0 %v1929_v44, %s2962_s4  ;;  %v428_v19 = vsel %vm320_vm1, %v423_v57, %v427_v21 }
 0x133   : > { %v715_v29 = vpop.f32.mrf.mxu0  ;;  %v2092_v60 = vsel %vm700_vm2, %v4495_v32, %v2091_v23 }
 0x134   : > { %2346 = vst [vmem:[%s4129_s8] sm:$0xff] %v2310_v42  ;;  %v804_v24 = vadd.f32 %v4064_v5, %v715_v29  ;;  %v1236_v36 = vpop.permute.xlu0 %1235  ;;  %2742 = vmatmul.msk.bf16.gmra.mxu2 %vm663_vm5, %v2092_v60 }
 0x135   : > { %v1313_v9 = vsel %vm619_vm4, %v1274_v15, %v1236_v36  ;;  %v2186_v47 = vpop.f32.mrf.mxu2  ;;  %1229 = vrot.lane.b32.xlu1 %v1194_v45, %s2962_s4  ;;  %v429_v15 = vshrl.u32 %v4082_v58, 16 }
 0x136   : > { %v1371_v44 = vrot.slane %v1313_v9, 1  ;;  %v1539_v35 = vadd.f32 %v1450_v26, %v804_v24  ;;  %570 = vrot.lane.b32.xlu2 %v535_v7, %s2962_s4  ;;  %v1859_v7 = vor.u32 %v1857_v28, %v4039_v48 }
 0x137   : > { %v1220_v33 = vpop.permute.xlu1 %1219  ;;  %v1453_v18 = vpop.f32.mrf.mxu1  ;;  %v431_v36 = vor.u32 %v429_v15, %v427_v21 }
 0x138   : > { %v2275_v3 = vadd.f32 %v2186_v47, %v1539_v35  ;;  %v1372_v39 = vsel %vm508_vm0, %v1369_v54, %v1371_v44  ;;  %v4145_v42 = vsel %vm619_vm4, %v1258_v16, %v1220_v33  ;;  %v4164_v60 = vpop.permute.xlu2 %1161 }
 0x139   : > { %2658 = vmatmul.msk.bf16.gmra.mxu3 %vm663_vm5, %v1372_v39  ;;  %v1355_v26 = vrot.slane %v4145_v42, 1  ;;  %v436_v30 = vsel %vm320_vm1, %v431_v36, %v3184_v56 }
 0x13a   : > { %v2311_v45 = vmax.f32 %v2275_v3, 0.0  ;;  %493 = vrot.lane.b32.xlu0 %v428_v19, %s2963_s5  ;;  %v4496_v3 = vrot.slane %v3167_v43, 1 }
 0x13b   : > { %v718_v63 = vpop.f32.mrf.mxu0  ;;  %v1356_v40 = vsel %vm508_vm0, %v1353_v25, %v1355_v26 }
 0x13c   : > { %2347 = vst [vmem:[%s4129_s8 + $0x8] sm:$0xff] %v2311_v45  ;;  %v805_v54 = vadd.f32 %v4064_v5, %v718_v63  ;;  %v484_v29 = vpop.permute.xlu0 %483  ;;  %2650 = vmatmul.msk.bf16.gmra.mxu1 %vm663_vm5, %v1356_v40  ;;  %v537_v39 = vsel %vm508_vm0, %v534_v53, %v4496_v3 }
 0x13d   : > { %v598_v32 = vsel %vm582_vm3, %v3446_v55, %v484_v29  ;;  %1974 = vrot.lane.b32.xlu1 %v1936_v34, %s2962_s4 }
 0x13e   : > { %v1540_v57 = vadd.f32 %v1453_v18, %v805_v54  ;;  %v2189_v31 = vpop.f32.mrf.mxu2  ;;  %v635_v25 = vsel %vm619_vm4, %v598_v32, %v4036_v49  ;;  %495 = vrot.lane.b32.xlu2 %v436_v30, %s2963_s5  ;;  %v875_v54 = vld [vmem:[%s3045_s30 + $0x98] sm:$0x1] }
 0x13f   : > { %2558 = vmatmul.msk.bf16.gmra.mxu0 %vm663_vm5, %v635_v25  ;;  %v1879_v24 = vpop.permute.xlu1 %1878  ;;  %v1455_v34 = vpop.f32.mrf.mxu1  ;;  %v951_v25 = vunpack.c.l.b16 %v875_v54 }
 0x140   : > { %v2276_v55 = vadd.f32 %v2189_v31, %v1540_v57  ;;  %v1959_v18 = vpop.permute.xlu2 %1958 }
 0x142   : > { %v2312_v9 = vmax.f32 %v2276_v55, 0.0  ;;  %1896 = vrot.lane.b32.xlu0 %v1859_v7, %s2963_s5 }
 0x143   : > { %v720_v47 = vpop.f32.mrf.mxu0 }
 0x144   : > { %2348 = vst [vmem:[%s4129_s8 + $0x10] sm:$0xff] %v2312_v9  ;;  %v806_v49 = vadd.f32 %v4064_v5, %v720_v47  ;;  %v1160_v48 = vpop.permute.xlu0 %1159  ;;  %v970_v9 = vpack.c.b16 %v951_v25, %v951_v25 }
 0x145   : > { %v1276_v35 = vsel %vm582_vm3, %v3490_v46, %v1160_v48 }
 0x146   : > { %v1315_v21 = vsel %vm619_vm4, %v1276_v35, %v4071_v62  ;;  %v1541_v16 = vadd.f32 %v1455_v34, %v806_v49  ;;  %v2191_v33 = vpop.f32.mrf.mxu2  ;;  %v1995_v62 = vsel %vm582_vm3, %v3499_v0, %v1879_v24  ;;  %v1279_v49 = vsel %vm582_vm3, %v970_v9, %v4164_v60 }
 0x147   : > { %v1373_v19 = vrot.slane %v1315_v21, 1  ;;  %v1144_v56 = vpop.permute.xlu1 %1143 }
 0x148   : > { %v2277_v45 = vadd.f32 %v2191_v33, %v1541_v16  ;;  %v1224_v55 = vpop.permute.xlu2 %1223 }
 0x149   : > { %v1374_v28 = vsel %vm508_vm0, %v1371_v44, %v1373_v19  ;;  %v1458_v46 = vpop.f32.mrf.mxu1  ;;  %v600_v44 = vsel %vm582_vm3, %v3581_v4, %v4122_v59  ;;  %v1260_v4 = vsel %vm582_vm3, %v3532_v11, %v1144_v56 }
 0x14a   : > { %v2313_v63 = vmax.f32 %v2277_v45, 0.0  ;;  %2659 = vmatmul.msk.bf16.gmra.mxu3 %vm663_vm5, %v1374_v28  ;;  %572 = vrot.lane.b32.xlu0 %v537_v39, %s2962_s4 }
 0x14c   : > { %2349 = vst [vmem:[%s4129_s8 + $0x18] sm:$0xff] %v2313_v63  ;;  %v723_v40 = vpop.f32.mrf.mxu0  ;;  %v1957_v43 = vpop.permute.xlu0 %1956 }
 0x14d   : > { %v807_v29 = vadd.f32 %v4064_v5, %v723_v40  ;;  %v2034_v53 = vsel %vm619_vm4, %v1995_v62, %v1957_v43 }
 0x14e   : > { %v2093_v32 = vrot.slane %v2034_v53, 2  ;;  %v2194_v57 = vpop.f32.mrf.mxu2 }
 0x14f   : > { %v1542_v31 = vadd.f32 %v1458_v46, %v807_v29  ;;  %v563_v7 = vpop.permute.xlu1 %562  ;;  %v4222_v46 = vpop.f32.mrf.mxu3 }
 0x150   : > { %v2094_v0 = vsel %vm700_vm2, %v2091_v23, %v2093_v32  ;;  %v637_v15 = vsel %vm619_vm4, %v600_v44, %v563_v7  ;;  %v1889_v45 = vpop.permute.xlu2 %1888 }
 0x151   : > { %v2278_v24 = vadd.f32 %v2194_v57, %v1542_v31  ;;  %2743 = vmatmul.msk.bf16.gmra.mxu2 %vm663_vm5, %v2094_v0  ;;  %2559 = vmatmul.msk.bf16.gmra.mxu0 %vm663_vm5, %v637_v15  ;;  %v1460_v34 = vpop.f32.mrf.mxu1 }
 0x153   : > { %v2314_v36 = vmax.f32 %v2278_v24, 0.0 }
 0x154   : > { %v725_v59 = vpop.f32.mrf.mxu0  ;;  %v1222_v30 = vpop.permute.xlu0 %1221 }
 0x155   : > { %2350 = vst [vmem:[%s4129_s8 + $0x20] sm:$0xff] %v2314_v36  ;;  %v808_v17 = vadd.f32 %v4064_v5, %v725_v59  ;;  %v1299_v23 = vsel %vm619_vm4, %v1260_v4, %v1222_v30 }
 0x156   : > { %v1357_v47 = vrot.slane %v1299_v23, 1  ;;  %v2196_v21 = vpop.f32.mrf.mxu2 }
 0x157   : > { %v1543_v48 = vadd.f32 %v1460_v34, %v808_v17  ;;  %v1240_v35 = vpop.permute.xlu1 %1239  ;;  %v4236_v7 = vpop.f32.mrf.mxu3 }
 0x158   : > { %v1358_v11 = vsel %vm508_vm0, %v1355_v26, %v1357_v47  ;;  %v1317_v16 = vsel %vm619_vm4, %v1279_v49, %v1240_v35  ;;  %v1967_v29 = vpop.permute.xlu2 %1966 }
 0x159   : > { %v2279_v33 = vadd.f32 %v2196_v21, %v1543_v48  ;;  %2651 = vmatmul.msk.bf16.gmra.mxu1 %vm663_vm5, %v1358_v11  ;;  %v1375_v56 = vrot.slane %v1317_v16, 1 }
 0x15b   : > { %v2315_v3 = vmax.f32 %v2279_v33, 0.0  ;;  %v1376_v39 = vsel %vm508_vm0, %v1373_v19, %v1375_v56 }
 0x15c   : > { %v1881_v28 = vpop.permute.xlu0 %1880  ;;  %2660 = vmatmul.msk.bf16.gmra.mxu3 %vm663_vm5, %v1376_v39 }
 0x15d   : > { %2351 = vst [vmem:[%s4129_s8 + $0x28] sm:$0xff] %v2315_v3  ;;  %v1997_v60 = vsel %vm582_vm3, %v3591_v1, %v1881_v28 }
 0x15e   : > { %v2036_v42 = vsel %vm619_vm4, %v1997_v60, %v1959_v18  ;;  %v728_v62 = vpop.f32.mrf.mxu0  ;;  %v2199_v1 = vpop.f32.mrf.mxu2 }
 0x15f   : > { %v2095_v26 = vrot.slane %v2036_v42, 2  ;;  %v488_v63 = vpop.permute.xlu1 %487  ;;  %v809_v43 = vadd.f32 %v4064_v5, %v728_v62 }
 0x160   : > { %v602_v15 = vsel %vm582_vm3, %v3654_v2, %v488_v63  ;;  %v490_v4 = vpop.permute.xlu2 %489 }
 0x161   : > { %v2096_v40 = vsel %vm700_vm2, %v2093_v32, %v2095_v26  ;;  %v4248_v49 = vpop.f32.mrf.mxu3 }
 0x162   : > { %2744 = vmatmul.msk.bf16.gmra.mxu2 %vm663_vm5, %v2096_v40  ;;  %v604_v40 = vsel %vm582_vm3, %v3727_v14, %v490_v4 }
 0x164   : > { %v1146_v19 = vpop.permute.xlu0 %1145 }
 0x165   : > { %v1262_v54 = vsel %vm582_vm3, %v3634_v20, %v1146_v19 }
 0x166   : > { %v4230_v18 = vsel %vm619_vm4, %v1262_v54, %v1224_v55  ;;  %v1463_v53 = vpop.f32.mrf.mxu1  ;;  %v730_v0 = vpop.f32.mrf.mxu0 }
 0x167   : > { %v1359_v57 = vrot.slane %v4230_v18, 1  ;;  %v1544_v44 = vadd.f32 %v1463_v53, %v809_v43  ;;  %v1883_v31 = vpop.permute.xlu1 %1882  ;;  %v810_v55 = vadd.f32 %v4064_v5, %v730_v0  ;;  %v2201_v23 = vpop.f32.mrf.mxu2 }
 0x168   : > { %v1999_v59 = vsel %vm582_vm3, %v3719_v41, %v1883_v31  ;;  %v2005_v41 = vsel %vm582_vm3, %v3757_v6, %v1889_v45  ;;  %v1885_v16 = vpop.permute.xlu2 %1884 }
 0x169   : > { %v2280_v32 = vadd.f32 %v2199_v1, %v1544_v44  ;;  %v1360_v25 = vsel %vm508_vm0, %v1357_v47, %v1359_v57  ;;  %v4256_v3 = vsel %vm619_vm4, %v2005_v41, %v1967_v29  ;;  %v4258_v28 = vpop.f32.mrf.mxu3 }
 0x16a   : > { %2652 = vmatmul.msk.bf16.gmra.mxu1 %vm663_vm5, %v1360_v25  ;;  %v2103_v6 = vrot.slane %v4256_v3, 2 }
 0x16b   : > { %v2316_v20 = vmax.f32 %v2280_v32, 0.0 }
 0x16c   : > { %v565_v24 = vpop.permute.xlu0 %564 }
 0x16d   : > { %2352 = vst [vmem:[%s4129_s8 + $0x30] sm:$0xff] %v2316_v20  ;;  %v639_v36 = vsel %vm619_vm4, %v602_v15, %v565_v24 }
 0x16e   : > { %2560 = vmatmul.msk.bf16.gmra.mxu0 %vm663_vm5, %v639_v36  ;;  %v1465_v9 = vpop.f32.mrf.mxu1 }
 0x16f   : > { %v1545_v30 = vadd.f32 %v1465_v9, %v810_v55  ;;  %v1961_v17 = vpop.permute.xlu1 %1960  ;;  %v2001_v55 = vsel %vm582_vm3, %v3771_v52, %v1885_v16 }
 0x170   : > { %v2038_v34 = vsel %vm619_vm4, %v1999_v59, %v1961_v17  ;;  %v1971_v1 = vpop.permute.xlu2 %1970 }
 0x171   : > { %v2281_v2 = vadd.f32 %v2201_v23, %v1545_v30  ;;  %v2097_v47 = vrot.slane %v2038_v34, 2  ;;  %v4278_v20 = vpop.f32.mrf.mxu3 }
 0x173   : > { %v2317_v48 = vmax.f32 %v2281_v2, 0.0  ;;  %v2098_v35 = vsel %vm700_vm2, %v2095_v26, %v2097_v47 }
 0x174   : > { %v1891_v21 = vpop.permute.xlu0 %1890  ;;  %2745 = vmatmul.msk.bf16.gmra.mxu2 %vm663_vm5, %v2098_v35  ;;  %v2204_v33 = vpop.f32.mrf.mxu2 }
 0x175   : > { %2353 = vst [vmem:[%s4129_s8 + $0x38] sm:$0xff] %v2317_v48  ;;  %v2007_v60 = vsel %vm582_vm3, %v3790_v37, %v1891_v21 }
 0x177   : > { %v1148_v11 = vpop.permute.xlu1 %1147  ;;  %v1468_v56 = vpop.f32.mrf.mxu1 }
 0x178   : > { %v1264_v31 = vsel %vm582_vm3, %v3748_v27, %v1148_v11 }
 0x179   : > { %v4297_v41 = vpop.f32.mrf.mxu3 }
 0x17b   : > { %v733_v39 = vpop.f32.mrf.mxu0 }
 0x17c   : > { %v811_v42 = vadd.f32 %v4064_v5, %v733_v39  ;;  %v1969_v26 = vpop.permute.xlu0 %1968  ;;  %v2206_v53 = vpop.f32.mrf.mxu2 }
 0x17d   : > { %v2046_v63 = vsel %vm619_vm4, %v2007_v60, %v1969_v26 }
 0x17e   : > { %v1546_v45 = vadd.f32 %v1468_v56, %v811_v42  ;;  %v2105_v62 = vrot.slane %v2046_v63, 2 }
 0x17f   : > { %v567_v19 = vpop.permute.xlu1 %566  ;;  %v1470_v14 = vpop.f32.mrf.mxu1 }
 0x180   : > { %v2282_v43 = vadd.f32 %v2204_v33, %v1546_v45  ;;  %v2106_v54 = vsel %vm700_vm2, %v2103_v6, %v2105_v62  ;;  %v641_v37 = vsel %vm619_vm4, %v604_v40, %v567_v19 }
 0x181   : > { %2749 = vmatmul.msk.bf16.vlgmr.msra.gmra.mxu3 %vm663_vm5, %v2106_v54  ;;  %2561 = vmatmul.msk.bf16.gmra.mxu0 %vm663_vm5, %v641_v37 }
 0x182   : > { %v2318_v29 = vmax.f32 %v2282_v43, 0.0 }
 0x183   : > { %v735_v44 = vpop.f32.mrf.mxu0 }
 0x184   : > { %2354 = vst [vmem:[%s4129_s8 + $0x40] sm:$0xff] %v2318_v29  ;;  %v812_v32 = vadd.f32 %v4064_v5, %v735_v44  ;;  %v1226_v25 = vpop.permute.xlu0 %1225  ;;  %v2209_v2 = vpop.f32.mrf.mxu2 }
 0x185   : > { %v1303_v0 = vsel %vm619_vm4, %v1264_v31, %v1226_v25 }
 0x186   : > { %v1547_v15 = vadd.f32 %v1470_v14, %v812_v32  ;;  %v1361_v24 = vrot.slane %v1303_v0, 1 }
 0x187   : > { %v1963_v36 = vpop.permute.xlu1 %1962 }
 0x188   : > { %v2283_v9 = vadd.f32 %v2206_v53, %v1547_v15  ;;  %v1362_v27 = vsel %vm508_vm0, %v1359_v57, %v1361_v24  ;;  %v4286_v4 = vsel %vm619_vm4, %v2001_v55, %v1963_v36  ;;  %v1228_v57 = vpop.permute.xlu2 %1227 }
 0x189   : > { %2653 = vmatmul.msk.bf16.gmra.mxu1 %vm663_vm5, %v1362_v27  ;;  %v2099_v59 = vrot.slane %v4286_v4, 2  ;;  %v1473_v34 = vpop.f32.mrf.mxu1 }
 0x18a   : > { %v2319_v30 = vmax.f32 %v2283_v9, 0.0  ;;  %v4306_v43 = vpop.f32.mrf.mxu3 }
 0x18b   : > { %v2100_v17 = vsel %vm700_vm2, %v2097_v47, %v2099_v59 }
 0x18c   : > { %2355 = vst [vmem:[%s4129_s8 + $0x48] sm:$0xff] %v2319_v30  ;;  %v738_v23 = vpop.f32.mrf.mxu0  ;;  %2746 = vmatmul.msk.bf16.gmra.mxu2 %vm663_vm5, %v2100_v17  ;;  %v1893_v18 = vpop.permute.xlu0 %1892 }
 0x18d   : > { %v813_v52 = vadd.f32 %v4064_v5, %v738_v23  ;;  %v2009_v48 = vsel %vm582_vm3, %v3830_v8, %v1893_v18  ;;  %v1610_v18 = vld [vmem:[%s3045_s30 + $0xa0] sm:$0x3]  ;;  %s2822_s30 = smul.u32 288, %s2952_s15  ;;  %s2397_s15 = sshll.u32 %s4129_s8, 4  ;;  %s2398_s15 = int_to_ptr.vmem [resolvable:$true] %s2397_s15 }
 0x18e   : > { %v2048_v21 = vsel %vm619_vm4, %v2009_v48, %v1971_v1 }
 0x18f   : > { %v1548_v35 = vadd.f32 %v1473_v34, %v813_v52  ;;  %v492_v11 = vpop.permute.xlu1 %491  ;;  %v2107_v47 = vrot.slane %v2048_v21, 2  ;;  %v1686_v21 = vunpack.c.l.b16 %v1610_v18  ;;  %v836_v18 = vadd.f32 %v4064_v5, %v4297_v41  ;;  %s2396_s10 = scalar_lea.hbm %s4476_s3, %s2822_s30 }
 0x190   : > { %v1895_v19 = vpop.permute.xlu2 %1894  ;;  %v606_v53 = vsel %vm582_vm3, %v3878_v12, %v492_v11  ;;  %s2399_s11 = sshll.u32 %s2396_s10, 4  ;;  %s2400_s11 = int_to_ptr.hbm [resolvable:$true] %s2399_s11 }
 0x191   : > { %v2284_v16 = vadd.f32 %v2209_v2, %v1548_v35  ;;  %v2108_v33 = vsel %vm700_vm2, %v2105_v62, %v2107_v47  ;;  %v1475_v8 = vpop.f32.mrf.mxu1  ;;  %v2211_v62 = vpop.f32.mrf.mxu2  ;;  %v2011_v31 = vsel %vm582_vm3, %v3948_v50, %v1895_v19  ;;  %s2896_s19 = sshra.s32 %s2400_s11, 4  ;;  %s2897_s19 = int_to_ptr.hbm [resolvable:$true] %s2896_s19 }
 0x192   : > { %2750 = vmatmul.msk.bf16.gmra.mxu3 %vm663_vm5, %v2108_v33  ;;  %v4318_v0 = vpop.f32.mrf.mxu3  ;;  %v1705_v33 = vpack.c.b16 %v1686_v21, %v1686_v21  ;;  %s2898_s21 = scalar_lea.hbm %s2897_s19, 288  ;;  %p2903_p1 = scmp.lt.s32.totalorder %s2897_s19, %s4476_s3 }
 0x193   : > { %v2320_v56 = vmax.f32 %v2284_v16, 0.0  ;;  %p2899_p12 = scmp.ne.s32.totalorder %s2897_s19, %s2898_s21  ;;  %p2904_p2 = scmp.lt.s32.totalorder %s2902_s27, %s2898_s21 }
 0x194   : > { %v740_v39 = vpop.f32.mrf.mxu0  ;;  %v1150_v42 = vpop.permute.xlu0 %1149 }
 0x195   : > { %2356 = vst [vmem:[%s4129_s8 + $0x50] sm:$0xff] %v2320_v56  ;;  %v814_v60 = vadd.f32 %v4064_v5, %v740_v39  ;;  %v1266_v26 = vsel %vm582_vm3, %v3847_v51, %v1150_v42  ;;  %p2900_p13 = pnand %p2899_p12, %p3025_p4  ;;  %p2905_p3 = por %p2904_p2, %p2903_p1 }
 0x196   : > { %v1305_v45 = vsel %vm619_vm4, %v1266_v26, %v1228_v57 }
 0x197   : > { %v1549_v63 = vadd.f32 %v1475_v8, %v814_v60  ;;  %v1887_v40 = vpop.permute.xlu1 %1886  ;;  %v1363_v54 = vrot.slane %v1305_v45, 1  ;;  %p2901_p0 = pneg %p2900_p13 }
 0x198   : > { %v1152_v15 = vpop.permute.xlu2 %1151  ;;  %v2003_v12 = vsel %vm582_vm3, %v3905_v38, %v1887_v40 }
 0x199   : > { %v2285_v37 = vadd.f32 %v2211_v62, %v1549_v63  ;;  %v1364_v29 = vsel %vm508_vm0, %v1361_v24, %v1363_v54  ;;  %v1268_v9 = vsel %vm582_vm3, %v3987_v10, %v1152_v15  ;;  %v2214_v57 = vpop.f32.mrf.mxu2  ;;  %p2906_p5 = pnand %p2905_p3, %p2901_p0 }
 0x19a   : > { %2654 = vmatmul.msk.bf16.gmra.mxu1 %vm663_vm5, %v1364_v29 }
 0x19b   : > { %v2321_v1 = vmax.f32 %v2285_v37, 0.0 }
 0x19c   : > { %v569_v51 = vpop.permute.xlu0 %568 }
 0x19d   : > { %2357 = vst [vmem:[%s4129_s8 + $0x58] sm:$0xff] %v2321_v1  ;;  %v643_v44 = vsel %vm619_vm4, %v606_v53, %v569_v51  ;;  %v833_v53 = vadd.f32 %v4064_v5, %v4248_v49 }
 0x19e   : > { %2562 = vmatmul.msk.bf16.gmra.mxu0 %vm663_vm5, %v643_v44 }
 0x19f   : > { %v1973_v14 = vpop.permute.xlu1 %1972 }
 0x1a0   : > { %v2050_v32 = vsel %vm619_vm4, %v2011_v31, %v1973_v14  ;;  %v571_v10 = vpop.permute.xlu2 %570 }
 0x1a1   : > { %v2109_v25 = vrot.slane %v2050_v32, 2  ;;  %v2216_v63 = vpop.f32.mrf.mxu2 }
 0x1a3   : > { %v2110_v24 = vsel %vm700_vm2, %v2107_v47, %v2109_v25 }
 0x1a4   : > { %2751 = vmatmul.msk.bf16.gmra.mxu3 %vm663_vm5, %v2110_v24  ;;  %v1965_v55 = vpop.permute.xlu0 %1964  ;;  %v4329_v34 = vpop.f32.mrf.mxu3 }
 0x1a5   : > { %v2042_v50 = vsel %vm619_vm4, %v2003_v12, %v1965_v55 }
 0x1a6   : > { %v2101_v36 = vrot.slane %v2042_v50, 2 }
 0x1a7   : > { %v1230_v27 = vpop.permute.xlu1 %1229  ;;  %v1478_v30 = vpop.f32.mrf.mxu1 }
 0x1a8   : > { %v1307_v4 = vsel %vm619_vm4, %v1268_v9, %v1230_v27  ;;  %v2102_v17 = vsel %vm700_vm2, %v2099_v59, %v2101_v36  ;;  %v2104_v37 = vsel %vm700_vm2, %v2101_v36, %v2103_v6 }
 0x1a9   : > { %v1365_v23 = vrot.slane %v1307_v4, 1  ;;  %2747 = vmatmul.msk.bf16.gmra.mxu2 %vm663_vm5, %v2102_v17 }
 0x1ab   : > { %v743_v52 = vpop.f32.mrf.mxu0  ;;  %v1366_v38 = vsel %vm508_vm0, %v1363_v54, %v1365_v23  ;;  %v496_v54 = vpop.permute.xlu2 %495  ;;  %v1368_v3 = vsel %vm508_vm0, %v1365_v23, %v1367_v61  ;;  %v834_v61 = vadd.f32 %v4064_v5, %v4258_v28  ;;  %v835_v23 = vadd.f32 %v4064_v5, %v4278_v20 }
 0x1ac   : > { %v815_v2 = vadd.f32 %v4064_v5, %v743_v52  ;;  %2655 = vmatmul.msk.bf16.gmra.mxu1 %vm663_vm5, %v1366_v38  ;;  %v494_v48 = vpop.permute.xlu0 %493  ;;  %v4341_v60 = vpop.f32.mrf.mxu3  ;;  %v610_v51 = vsel %vm582_vm3, %v4082_v58, %v496_v54 }
 0x1ad   : > { %v608_v59 = vsel %vm582_vm3, %v3961_v22, %v494_v48 }
 0x1ae   : > { %v1550_v35 = vadd.f32 %v1478_v30, %v815_v2  ;;  %v645_v11 = vsel %vm619_vm4, %v608_v59, %v571_v10 }
 0x1af   : > { %2563 = vmatmul.msk.bf16.gmra.mxu0 %vm663_vm5, %v645_v11  ;;  %v1480_v56 = vpop.f32.mrf.mxu1  ;;  %v1975_v8 = vpop.permute.xlu1 %1974 }
 0x1b0   : > { %v2286_v47 = vadd.f32 %v2214_v57, %v1550_v35 }
 0x1b2   : > { %v2322_v16 = vmax.f32 %v2286_v47, 0.0 }
 0x1b3   : > { %v745_v39 = vpop.f32.mrf.mxu0 }
 0x1b4   : > { %2358 = vst [vmem:[%s4129_s8 + $0x60] sm:$0xff] %v2322_v16  ;;  %v816_v42 = vadd.f32 %v4064_v5, %v745_v39  ;;  %v1897_v26 = vpop.permute.xlu0 %1896  ;;  %v837_v16 = vadd.f32 %v4064_v5, %v4306_v43 }
 0x1b5   : > { %v2014_v45 = vsel %vm582_vm3, %v1705_v33, %v1897_v26 }
 0x1b6   : > { %v1551_v22 = vadd.f32 %v1480_v56, %v816_v42  ;;  %v2052_v40 = vsel %vm619_vm4, %v2014_v45, %v1975_v8 }
 0x1b7   : > { %v2111_v62 = vrot.slane %v2052_v40, 2 }
 0x1b8   : > { %v2287_v19 = vadd.f32 %v2216_v63, %v1551_v22  ;;  %v838_v63 = vadd.f32 %v4064_v5, %v4318_v0 }
 0x1b9   : > { %2748 = vmatmul.msk.bf16.gmra.mxu2 %vm663_vm5, %v2104_v37  ;;  %v2112_v1 = vsel %vm700_vm2, %v2109_v25, %v2111_v62  ;;  %v1483_v44 = vpop.f32.mrf.mxu1  ;;  %v2219_v25 = vpop.f32.mrf.mxu2 }
 0x1ba   : > { %v2323_v29 = vmax.f32 %v2287_v19, 0.0  ;;  %2752 = vmatmul.msk.bf16.gmra.mxu3 %vm663_vm5, %v2112_v1 }
 0x1bc   : > { %2359 = vst [vmem:[%s4129_s8 + $0x68] sm:$0xff] %v2323_v29  ;;  %v748_v6 = vpop.f32.mrf.mxu0  ;;  %v1523_v31 = vpop.f32.mrf.mxu3  ;;  %2656 = vmatmul.msk.bf16.gmra.mxu1 %vm663_vm5, %v1368_v3 }
 0x1bd   : > { %v817_v14 = vadd.f32 %v4064_v5, %v748_v6  ;;  %v4362_v32 = vadd.f32 %v1523_v31, %v833_v53  ;;  %v573_v49 = vpop.permute.xlu0 %572 }
 0x1be   : > { %v647_v15 = vsel %vm619_vm4, %v610_v51, %v573_v49 }
 0x1bf   : > { %v1552_v58 = vadd.f32 %v1483_v44, %v817_v14  ;;  %2564 = vmatmul.msk.bf16.gmra.mxu0 %vm663_vm5, %v647_v15  ;;  %v831_v14 = vadd.f32 %v4064_v5, %v4222_v46 }
 0x1c1   : > { %v2288_v13 = vadd.f32 %v2219_v25, %v1552_v58  ;;  %v1485_v9 = vpop.f32.mrf.mxu1  ;;  %v2221_v4 = vpop.f32.mrf.mxu2  ;;  %v1566_v49 = vadd.f32 %v4329_v34, %v831_v14 }
 0x1c3   : > { %v2324_v24 = vmax.f32 %v2288_v13, 0.0 }
 0x1c4   : > { %v750_v12 = vpop.f32.mrf.mxu0  ;;  %v1525_v55 = vpop.f32.mrf.mxu3 }
 0x1c5   : > { %2360 = vst [vmem:[%s4129_s8 + $0x70] sm:$0xff] %v2324_v24  ;;  %v818_v50 = vadd.f32 %v4064_v5, %v750_v12  ;;  %v4370_v36 = vadd.f32 %v1525_v55, %v834_v61  ;;  %v832_v55 = vadd.f32 %v4064_v5, %v4236_v7 }
 0x1c7   : > { %v1553_v27 = vadd.f32 %v1485_v9, %v818_v50  ;;  %v1567_v46 = vadd.f32 %v4341_v60, %v832_v55 }
 0x1c9   : > { %v2289_v30 = vadd.f32 %v2221_v4, %v1553_v27 }
 0x1cb   : > { %v2325_v17 = vmax.f32 %v2289_v30, 0.0 }
 0x1cd   : > { %2361 = vst [vmem:[%s4129_s8 + $0x78] sm:$0xff] %v2325_v17  ;;  %v1528_v52 = vpop.f32.mrf.mxu3 }
 0x1ce   : > { %v4375_v28 = vadd.f32 %v1528_v52, %v835_v23  ;;  %v753_v38 = vpop.f32.mrf.mxu0 }
 0x1cf   : > { %v819_v57 = vadd.f32 %v4064_v5, %v753_v38 }
 0x1d4   : > { %v2224_v10 = vpop.f32.mrf.mxu2 }
 0x1d5   : > { %v1530_v2 = vpop.f32.mrf.mxu3 }
 0x1d6   : > { %v4380_v48 = vadd.f32 %v1530_v2, %v836_v18  ;;  %v1488_v35 = vpop.f32.mrf.mxu1  ;;  %v755_v11 = vpop.f32.mrf.mxu0 }
 0x1d7   : > { %v1554_v59 = vadd.f32 %v1488_v35, %v819_v57  ;;  %v820_v47 = vadd.f32 %v4064_v5, %v755_v11 }
 0x1d9   : > { %v2290_v21 = vadd.f32 %v2224_v10, %v1554_v59 }
 0x1db   : > { %v2326_v20 = vmax.f32 %v2290_v21, 0.0 }
 0x1dc   : > { %v2226_v39 = vpop.f32.mrf.mxu2 }
 0x1dd   : > { %2362 = vst [vmem:[%s4129_s8 + $0x80] sm:$0xff] %v2326_v20 }
 0x1de   : > { %v1490_v33 = vpop.f32.mrf.mxu1 }
 0x1df   : > { %v1555_v41 = vadd.f32 %v1490_v33, %v820_v47  ;;  %v1533_v56 = vpop.f32.mrf.mxu3 }
 0x1e0   : > { %v4386_v42 = vadd.f32 %v1533_v56, %v837_v16 }
 0x1e1   : > { %v2291_v8 = vadd.f32 %v2226_v39, %v1555_v41 }
 0x1e3   : > { %v2327_v26 = vmax.f32 %v2291_v8, 0.0 }
 0x1e5   : > { %2363 = vst [vmem:[%s4129_s8 + $0x88] sm:$0xff] %v2327_v26  ;;  %v2229_v62 = vpop.f32.mrf.mxu2 }
 0x1e7   : > { %v1535_v22 = vpop.f32.mrf.mxu3  ;;  %v1493_v40 = vpop.f32.mrf.mxu1 }
 0x1e8   : > { %v4391_v45 = vadd.f32 %v1535_v22, %v838_v63 }
 0x1eb   : > { %v758_v19 = vpop.f32.mrf.mxu0 }
 0x1ec   : > { %v821_v43 = vadd.f32 %v4064_v5, %v758_v19 }
 0x1ed   : > { %v2231_v0 = vpop.f32.mrf.mxu2 }
 0x1ee   : > { %v1556_v54 = vadd.f32 %v1493_v40, %v821_v43 }
 0x1ef   : > { %v1495_v51 = vpop.f32.mrf.mxu1 }
 0x1f0   : > { %v2292_v37 = vadd.f32 %v2229_v62, %v1556_v54 }
 0x1f2   : > { %v2328_v29 = vmax.f32 %v2292_v37, 0.0 }
 0x1f3   : > { %v760_v1 = vpop.f32.mrf.mxu0 }
 0x1f4   : > { %2364 = vst [vmem:[%s4129_s8 + $0x90] sm:$0xff] %v2328_v29  ;;  %v822_v53 = vadd.f32 %v4064_v5, %v760_v1 }
 0x1f6   : > { %v1557_v44 = vadd.f32 %v1495_v51, %v822_v53 }
 0x1f7   : > { %v2234_v13 = vpop.f32.mrf.mxu2 }
 0x1f8   : > { %v2293_v3 = vadd.f32 %v2231_v0, %v1557_v44 }
 0x1fa   : > { %v2329_v6 = vmax.f32 %v2293_v3, 0.0 }
 0x1fc   : > { %2365 = vst [vmem:[%s4129_s8 + $0x98] sm:$0xff] %v2329_v6 }
 0x1fe   : > { %v763_v31 = vpop.f32.mrf.mxu0 }
 0x1ff   : > { %v823_v15 = vadd.f32 %v4064_v5, %v763_v31  ;;  %v2236_v38 = vpop.f32.mrf.mxu2 }
 0x204   : > { %v2254_v25 = vpop.f32.mrf.mxu3 }
 0x205   : > { %v2302_v58 = vadd.f32 %v2254_v25, %v1566_v49 }
 0x206   : > { %v1498_v61 = vpop.f32.mrf.mxu1  ;;  %v765_v9 = vpop.f32.mrf.mxu0 }
 0x207   : > { %v2338_v24 = vmax.f32 %v2302_v58, 0.0  ;;  %v1558_v12 = vadd.f32 %v1498_v61, %v823_v15  ;;  %v824_v4 = vadd.f32 %v4064_v5, %v765_v9 }
 0x209   : > { %2374 = vst [vmem:[%s4129_s8 + $0xe0] sm:$0xff] %v2338_v24  ;;  %v2294_v50 = vadd.f32 %v2234_v13, %v1558_v12 }
 0x20b   : > { %v2330_v27 = vmax.f32 %v2294_v50, 0.0 }
 0x20c   : > { %v2256_v34 = vpop.f32.mrf.mxu3 }
 0x20d   : > { %2366 = vst [vmem:[%s4129_s8 + $0xa0] sm:$0xff] %v2330_v27  ;;  %v2303_v30 = vadd.f32 %v2256_v34, %v1567_v46 }
 0x20e   : > { %v1500_v17 = vpop.f32.mrf.mxu1 }
 0x20f   : > { %v2339_v23 = vmax.f32 %v2303_v30, 0.0  ;;  %v1559_v52 = vadd.f32 %v1500_v17, %v824_v4  ;;  %v2239_v35 = vpop.f32.mrf.mxu2 }
 0x211   : > { %2375 = vst [vmem:[%s4129_s8 + $0xe8] sm:$0xff] %v2339_v23  ;;  %v2295_v18 = vadd.f32 %v2236_v38, %v1559_v52 }
 0x213   : > { %v2331_v7 = vmax.f32 %v2295_v18, 0.0 }
 0x215   : > { %2367 = vst [vmem:[%s4129_s8 + $0xa8] sm:$0xff] %v2331_v7  ;;  %v2259_v57 = vpop.f32.mrf.mxu3 }
 0x216   : > { %v2304_v2 = vadd.f32 %v2259_v57, %v4362_v32 }
 0x217   : > { %v1503_v60 = vpop.f32.mrf.mxu1  ;;  %v2241_v39 = vpop.f32.mrf.mxu2 }
 0x218   : > { %v2340_v10 = vmax.f32 %v2304_v2, 0.0 }
 0x21a   : > { %2376 = vst [vmem:[%s4129_s8 + $0xf0] sm:$0xff] %v2340_v10 }
 0x21b   : > { %v768_v59 = vpop.f32.mrf.mxu0 }
 0x21c   : > { %v825_v21 = vadd.f32 %v4064_v5, %v768_v59 }
 0x21d   : > { %v2261_v11 = vpop.f32.mrf.mxu3 }
 0x21e   : > { %v1560_v20 = vadd.f32 %v1503_v60, %v825_v21  ;;  %v2305_v47 = vadd.f32 %v2261_v11, %v4370_v36 }
 0x21f   : > { %v1505_v41 = vpop.f32.mrf.mxu1 }
 0x220   : > { %v2296_v16 = vadd.f32 %v2239_v35, %v1560_v20  ;;  %v2341_v33 = vmax.f32 %v2305_v47, 0.0 }
 0x222   : > { %v2332_v56 = vmax.f32 %v2296_v16, 0.0  ;;  %2377 = vst [vmem:[%s4129_s8 + $0xf8] sm:$0xff] %v2341_v33 }
 0x223   : > { %v770_v32 = vpop.f32.mrf.mxu0 }
 0x224   : > { %2368 = vst [vmem:[%s4129_s8 + $0xb0] sm:$0xff] %v2332_v56  ;;  %v826_v8 = vadd.f32 %v4064_v5, %v770_v32 }
 0x226   : > { %v1561_v26 = vadd.f32 %v1505_v41, %v826_v8 }
 0x227   : > { %v2264_v63 = vpop.f32.mrf.mxu3 }
 0x228   : > { %v2306_v22 = vadd.f32 %v2264_v63, %v4375_v28  ;;  %v2297_v40 = vadd.f32 %v2241_v39, %v1561_v26 }
 0x229   : > { %v1508_v19 = vpop.f32.mrf.mxu1 }
 0x22a   : > { %v2342_v36 = vmax.f32 %v2306_v22, 0.0  ;;  %v2333_v43 = vmax.f32 %v2297_v40, 0.0 }
 0x22c   : > { %2378 = vst [vmem:[%s4129_s8 + $0x100] sm:$0xff] %v2342_v36  ;;  %v773_v62 = vpop.f32.mrf.mxu0  ;;  %v2244_v54 = vpop.f32.mrf.mxu2 }
 0x22d   : > { %2369 = vst [vmem:[%s4129_s8 + $0xb8] sm:$0xff] %v2333_v43  ;;  %v827_v37 = vadd.f32 %v4064_v5, %v773_v62 }
 0x22f   : > { %v2266_v29 = vpop.f32.mrf.mxu3  ;;  %v1562_v1 = vadd.f32 %v1508_v19, %v827_v37 }
 0x230   : > { %v2307_v53 = vadd.f32 %v2266_v29, %v4380_v48 }
 0x231   : > { %v2298_v51 = vadd.f32 %v2244_v54, %v1562_v1  ;;  %v1510_v28 = vpop.f32.mrf.mxu1 }
 0x232   : > { %v2343_v44 = vmax.f32 %v2307_v53, 0.0 }
 0x233   : > { %v2334_v0 = vmax.f32 %v2298_v51, 0.0 }
 0x234   : > { %2379 = vst [vmem:[%s4129_s8 + $0x108] sm:$0xff] %v2343_v44  ;;  %v775_v3 = vpop.f32.mrf.mxu0  ;;  %v2246_v6 = vpop.f32.mrf.mxu2 }
 0x235   : > { %2370 = vst [vmem:[%s4129_s8 + $0xc0] sm:$0xff] %v2334_v0  ;;  %v828_v31 = vadd.f32 %v4064_v5, %v775_v3 }
 0x237   : > { %v1563_v14 = vadd.f32 %v1510_v28, %v828_v31 }
 0x239   : > { %v2299_v49 = vadd.f32 %v2246_v6, %v1563_v14  ;;  %v1513_v58 = vpop.f32.mrf.mxu1 }
 0x23b   : > { %v2335_v25 = vmax.f32 %v2299_v49, 0.0 }
 0x23c   : > { %v778_v15 = vpop.f32.mrf.mxu0  ;;  %v2249_v61 = vpop.f32.mrf.mxu2 }
 0x23d   : > { %2371 = vst [vmem:[%s4129_s8 + $0xc8] sm:$0xff] %v2335_v25  ;;  %v829_v48 = vadd.f32 %v4064_v5, %v778_v15  ;;  %v2269_v13 = vpop.f32.mrf.mxu3 }
 0x23e   : > { %v2308_v24 = vadd.f32 %v2269_v13, %v4386_v42 }
 0x23f   : > { %v1564_v12 = vadd.f32 %v1513_v58, %v829_v48 }
 0x240   : > { %v2344_v55 = vmax.f32 %v2308_v24, 0.0 }
 0x241   : > { %v2300_v50 = vadd.f32 %v2249_v61, %v1564_v12  ;;  %v1515_v4 = vpop.f32.mrf.mxu1 }
 0x242   : > { %2380 = vst [vmem:[%s4129_s8 + $0x110] sm:$0xff] %v2344_v55 }
 0x243   : > { %v2336_v9 = vmax.f32 %v2300_v50, 0.0 }
 0x244   : > { %v780_v46 = vpop.f32.mrf.mxu0  ;;  %v2251_v17 = vpop.f32.mrf.mxu2 }
 0x245   : > { %2372 = vst [vmem:[%s4129_s8 + $0xd0] sm:$0xff] %v2336_v9  ;;  %v830_v27 = vadd.f32 %v4064_v5, %v780_v46  ;;  %v2271_v34 = vpop.f32.mrf.mxu3 }
 0x246   : > { %v2309_v42 = vadd.f32 %v2271_v34, %v4391_v45 }
 0x247   : > { %v1565_v30 = vadd.f32 %v1515_v4, %v830_v27 }
 0x248   : > { %v2345_v23 = vmax.f32 %v2309_v42, 0.0 }
 0x249   : > { %v2301_v52 = vadd.f32 %v2251_v17, %v1565_v30 }
 0x24a   : > { %2381 = vst [vmem:[%s4129_s8 + $0x118] sm:$0xff] %v2345_v23 }
 0x24b   : > { %v2337_v38 = vmax.f32 %v2301_v52, 0.0 }
 0x24d   : > { %2373 = vst [vmem:[%s4129_s8 + $0xd8] sm:$0xff] %v2337_v38 }
 0x24e   : > { %2909 = shalt.err (!%p2906_p5)
}
 0x24f   : > { %s2964_s6 = smov 128  }
 0x250   : > { %2823 = dma.vmem_to_hbm [thread:$0]  (%p3025_p4), %s2398_s15, 4608, %s2400_s11, %s2383_s18, %s2964_s6, %s2964_s6, %s2962_s4  }
 0x251 PF: > { %p2829_p6 = scmp.ge.s32.totalorder %s2960_s17, 2  ;;  %s2414_s7 = sand.u32 1, %s2940_s12  }
 0x252   : > { %s2415_s8 = scalar_lea.sflag [#allocation3], %s2414_s7 }
 0x253   : > { %p2826_p7 = pnand %p2829_p6, %p3032_p8 }
 0x255   : > { %p2827_p9 = pneg %p2826_p7 }
 0x257   : > { %2935 = dma.done.wait (%p2827_p9), %s2415_s8, 4608  }
 0x258   : > { %2937 = vsyncadd (%p2827_p9), %s2415_s8, 4294962688  ;;  %s16_s17 = sadd.s32 1, %s2960_s17   ;;  %s4497_s12 = smov %s2944_s13 }
 0x259   : > { %p13_p10 = scmp.ge.s32.totalorder %s16_s17, 4   ;;  %s4498_s13 = smov %s2948_s14 }
 0x25a   : > { %s4499_s14 = smov %s3038_s25  ;;  %s4500_s15 = smov %s2956_s16 }
 0x25b   : > { %s4501_s16 = smov %s4503_s20  ;;  %15 = sbr.rel (!%p13_p10) target bundleno = 4 (0x4), region = 69 }
 0x260   :  { %2421 = vsyncpa [#allocation3], 1 }
 0x261   :  { %2423 = vsyncpa [#allocation3 + $0x1], 1 }

</bundles_post_ra>
